<compile_context>
chip_gen: v7x
topology: tpu7x:2x2x1
jax: 0.10.0
libtpu: 0.0.40
codegen_flags: <defaults>
</compile_context>

<pallas_src>
import functools
import math

import jax
import jax.numpy as jnp
from jax.experimental import pallas as pl
from jax.experimental.pallas import tpu as pltpu


def _round_up(v, m):
    return ((v + m - 1) // m) * m


# --------------------------------- kernel -----------------------------------

def _fusion_kernel(x_ref, y_ref, wx_ref, wy_ref, b_ref, o_ref, *, fast_act, split_rg):
    """One row tile of: out = x + g * (gelu(lin_r) - x), with
    lin_{r,g} = x @ Wx_{r,g} + y @ Wy_{r,g} + b_{r,g}  (the (x - y) concat block is
    folded into Wx/Wy in the wrapper; r and g share the fused [Dp, 2*Dp] weights)."""
    x = x_ref[...]
    y = y_ref[...]
    dp = o_ref.shape[-1]                      # padded feature dim (multiple of 128)

    # Feed the MXU in the weights' dtype (bf16 weights -> bf16 x bf16 matmul, f32 accumulate).
    xm = x.astype(wx_ref.dtype)
    ym = y.astype(wy_ref.dtype)

    if split_rg:
        # Large Dp: two N=Dp dots halve the peak (tm, 2*Dp) f32 intermediate and avoid
        # slicing a big VMEM-staged result.
        r_lin = (jnp.dot(xm, wx_ref[:, :dp], preferred_element_type=jnp.float32)
                 + jnp.dot(ym, wy_ref[:, :dp], preferred_element_type=jnp.float32)
                 + b_ref[:, :dp].astype(jnp.float32))
        g_lin = (jnp.dot(xm, wx_ref[:, dp:], preferred_element_type=jnp.float32)
                 + jnp.dot(ym, wy_ref[:, dp:], preferred_element_type=jnp.float32)
                 + b_ref[:, dp:].astype(jnp.float32))
    else:
        # Small Dp: one fused N=2*Dp dot fills the 256-wide MXU (v6e/v7x); slices below
        # are 128-lane aligned.
        lin = (jnp.dot(xm, wx_ref[...], preferred_element_type=jnp.float32)
               + jnp.dot(ym, wy_ref[...], preferred_element_type=jnp.float32)
               + b_ref[...].astype(jnp.float32))
        r_lin = lin[:, :dp]
        g_lin = lin[:, dp:]

    if fast_act:
        # tanh-GELU + exp/rcp sigmoid: transcendentals go to the EUP slot instead of a
        # long erf polynomial on the VALU slot (slightly different numerics vs. erf).
        c = jnp.float32(math.sqrt(2.0 / math.pi))
        r_ = 0.5 * r_lin * (1.0 + jnp.tanh(c * (r_lin + 0.044715 * (r_lin * r_lin * r_lin))))
        g_ = pl.reciprocal(1.0 + jnp.exp(-g_lin), approx=True)
    else:
        # Exact erf form, matching the PyTorch reference numerics.
        inv_sqrt2 = jnp.float32(1.0 / math.sqrt(2.0))
        r_ = r_lin * 0.5 * (1.0 + jax.lax.erf(r_lin * inv_sqrt2))
        g_ = jax.nn.sigmoid(g_lin)

    xf = x.astype(jnp.float32)
    # g*r + (1-g)*x == x + g*(r - x): one fewer VALU op per element.
    o_ref[...] = (xf + g_ * (r_ - xf)).astype(o_ref.dtype)


# ------------------------------ tile planning --------------------------------

def _plan_tiles(m_rows, d_pad, act_bytes, w_bytes, tm_max=512):
    """Pick the row tile and VMEM limit from the full VMEM picture: resident fused
    weights, double-buffered x/y/out tiles and the f32 epilogue temporaries."""
    try:
        vmem_cap = int(pltpu.get_tpu_info().vmem_capacity_bytes)
    except Exception:
        vmem_cap = 64 << 20                    # conservative: v7x per-TensorCore VMEM

    budget = int(vmem_cap * 0.7)               # headroom for compiler scratch / regalloc

    # Fused weights Wx, Wy ([Dp, 2*Dp]) + bias.  Counted x2 in case the runtime falls
    # back to default double buffering for them.
    w_resident = (2 * d_pad * (2 * d_pad) + 2 * d_pad) * w_bytes

    # Per row: double-buffered x, y, out tiles + ~3 f32 (row, 2*Dp) temporaries.
    per_row = 2 * 3 * d_pad * act_bytes + 3 * (2 * d_pad) * 4

    row_mult = 16 if act_bytes < 4 else 8      # bf16 packs 16 rows per sublane group
    avail = max(budget - 2 * w_resident, per_row * row_mult)
    tm = int(min(tm_max, avail // per_row))
    tm = max(row_mult, (tm // row_mult) * row_mult)

    m_min = _round_up(max(m_rows, 1), row_mult)
    if m_min > row_mult:
        # Keep >= 2 grid steps so the "parallel" axis can feed both v7x TensorCores.
        tm = min(tm, _round_up(-(-m_min // 2), row_mult))
    tm = min(tm, m_min)

    used = 2 * w_resident + per_row * tm
    vmem_limit = int(min(int(vmem_cap * 0.8), max(used + (4 << 20), 32 << 20)))
    return tm, vmem_limit


# ------------------------------ parameter prep --------------------------------

def prepare_fusion_params(wr, br, wg, bg, *, matmul_dtype=None):
    """One-time weight prep (hoisted out of the forward pass):
      * fold the (x - y) block:  cat([x, y, x-y]) @ W == x @ (W0 + W2) + y @ (W1 - W2)
      * fuse the r- and g-linears into one [Dp, 2*Dp] weight (shared activations)
      * zero-pad the feature dim to a multiple of 128 (lane-dense stores; exact since
        gelu(0) = 0 and padded x is 0)
      * optionally cast weights to bf16 for the fast MXU path (v6e / v7x)."""
    d = wr.shape[1]
    assert wr.shape == (3 * d, d) and wg.shape == (3 * d, d)

    wr_x, wr_y = wr[:d] + wr[2 * d:], wr[d:2 * d] - wr[2 * d:]     # [D, D]
    wg_x, wg_y = wg[:d] + wg[2 * d:], wg[d:2 * d] - wg[2 * d:]

    d_pad = _round_up(d, 128)
    pad_f = d_pad - d

    def _pad_w(w):
        return jnp.pad(w, ((0, pad_f), (0, pad_f))) if pad_f else w

    def _pad_b(b):
        return jnp.pad(b, (0, pad_f)) if pad_f else b

    w_x = jnp.concatenate([_pad_w(wr_x), _pad_w(wg_x)], axis=1)     # [Dp, 2*Dp]
    w_y = jnp.concatenate([_pad_w(wr_y), _pad_w(wg_y)], axis=1)     # [Dp, 2*Dp]
    if matmul_dtype is not None:
        w_x = w_x.astype(matmul_dtype)
        w_y = w_y.astype(matmul_dtype)
    b_rg = jnp.concatenate([_pad_b(br), _pad_b(bg)]).astype(jnp.float32).reshape(1, 2 * d_pad)

    return {"w_x": w_x, "w_y": w_y, "b": b_rg, "d": d, "d_pad": d_pad}


# --------------------------------- wrapper ------------------------------------

def _build_call(tm, m_pad, d_pad, out_dtype, act_bytes, w_bytes, vmem_limit,
                fast_act, single_buffer_weights):
    split_rg = d_pad > 256
    kernel = functools.partial(_fusion_kernel, fast_act=fast_act, split_rg=split_rg)

    w_kwargs = ({"pipeline_mode": pl.Buffered(buffer_count=1)}
                if single_buffer_weights else {})
    grid = (m_pad // tm,)

    cost = pl.CostEstimate(
        flops=2 * 2 * m_pad * d_pad * (2 * d_pad),                  # two [M,Dp] x [Dp,2Dp] dots
        transcendentals=2 * m_pad * d_pad,
        bytes_accessed=(3 * m_pad * d_pad * act_bytes               # x, y, out
                        + 2 * d_pad * 2 * d_pad * w_bytes           # Wx, Wy (read once)
                        + 2 * d_pad * 4),                           # fused bias
    )

    # TODO(synk): add a column/K grid axis for d_hid >~ 1k so the [Dp, 2*Dp] weights need
    # not be fully VMEM-resident (v7x has only 64 MiB per TensorCore).
    return pl.pallas_call(
        kernel,
        out_shape=jax.ShapeDtypeStruct((m_pad, d_pad), out_dtype),
        grid_spec=pltpu.PrefetchScalarGridSpec(
            num_scalar_prefetch=0,
            grid=grid,
            in_specs=[
                pl.BlockSpec((tm, d_pad), lambda i: (i, 0)),                     # x tile
                pl.BlockSpec((tm, d_pad), lambda i: (i, 0)),                     # y tile
                pl.BlockSpec((d_pad, 2 * d_pad), lambda i: (0, 0), **w_kwargs),  # Wx (resident)
                pl.BlockSpec((d_pad, 2 * d_pad), lambda i: (0, 0), **w_kwargs),  # Wy (resident)
                pl.BlockSpec((1, 2 * d_pad), lambda i: (0, 0), **w_kwargs),      # fused bias
            ],
            out_specs=pl.BlockSpec((tm, d_pad), lambda i: (i, 0)),
        ),
        compiler_params=pltpu.CompilerParams(
            dimension_semantics=("parallel",),
            vmem_limit_bytes=vmem_limit,
        ),
        cost_estimate=cost,
    )


def fusion_forward(x, y, params, *, fast_act=True, tm_max=512):
    """x, y: [..., d_hid].  `params` comes from prepare_fusion_params (call once, reuse)."""
    d, d_pad = params["d"], params["d_pad"]
    w_x, w_y, b = params["w_x"], params["w_y"], params["b"]

    orig_shape = x.shape
    x2 = x.reshape(-1, d)
    y2 = y.reshape(-1, d)
    m = x2.shape[0]

    act_bytes = jnp.dtype(x.dtype).itemsize
    w_bytes = jnp.dtype(w_x.dtype).itemsize
    tm, vmem_limit = _plan_tiles(m, d_pad, act_bytes, w_bytes, tm_max=tm_max)

    pad_f = d_pad - d
    m_pad = _round_up(m, tm)
    padded = bool(pad_f) or (m_pad != m)
    if padded:                                   # skip the extra HBM pass when already aligned
        x2 = jnp.pad(x2, ((0, m_pad - m), (0, pad_f)))
        y2 = jnp.pad(y2, ((0, m_pad - m), (0, pad_f)))

    args = (x2, y2, w_x, w_y, b)
    try:
        out = _build_call(tm, m_pad, d_pad, x.dtype, act_bytes, w_bytes, vmem_limit,
                          fast_act, single_buffer_weights=True)(*args)
    except Exception:
        # pl.Buffered(1) not supported by this jax/Mosaic build -> default double-buffered
        # weight specs (costs 2x resident weight VMEM; already budgeted in _plan_tiles).
        out = _build_call(tm, m_pad, d_pad, x.dtype, act_bytes, w_bytes, vmem_limit,
                          fast_act, single_buffer_weights=False)(*args)

    if padded:
        out = out[:m, :d]
    return out.reshape(orig_shape)


# ------------------------------ reference / init -------------------------------

def _init_linear(key, out_features, in_features, dtype=jnp.float32):
    """Deterministic init mimicking torch.nn.Linear defaults (uniform +/- 1/sqrt(fan_in))."""
    kw, kb = jax.random.split(key)
    bound = 1.0 / math.sqrt(in_features)
    w = jax.random.uniform(kw, (out_features, in_features), dtype, -bound, bound)
    b = jax.random.uniform(kb, (out_features,), dtype, -bound, bound)
    return w, b


def _reference(x, y, wr, br, wg, bg):
    cat = jnp.concatenate([x, y, x - y], axis=-1)
    r_lin = cat @ wr + br
    g_lin = cat @ wg + bg
    r_ = r_lin * 0.5 * (1.0 + jax.lax.erf(r_lin / jnp.sqrt(2.0)))
    g_ = jax.nn.sigmoid(g_lin)
    return g_ * r_ + (1.0 - g_) * x


if __name__ == "__main__":
    d_hid = 32
    batch, seq = 2, 8

    key = jax.random.PRNGKey(0)
    kx, ky, kr, kg = jax.random.split(key, 4)

    x = jax.random.normal(kx, (batch, seq, d_hid), jnp.float32)
    y = jax.random.normal(ky, (batch, seq, d_hid), jnp.float32)

    # nn.Linear(d_hid*3, d_hid) weights: [d_hid, 3*d_hid]; stored transposed for the kernel.
    wr_t, br = _init_linear(kr, d_hid, 3 * d_hid)
    wg_t, bg = _init_linear(kg, d_hid, 3 * d_hid)
    wr = wr_t.T   # [3*d_hid, d_hid]
    wg = wg_t.T

    ref = _reference(x, y, wr, br, wg, bg)

    # One-time parameter prep (weight folding / fusing / padding hoisted out of forward).
    params_f32 = prepare_fusion_params(wr, br, wg, bg)

    # Exact path (erf GELU, f32 matmul): matches reference up to weight-fold reassociation.
    out_exact = jax.block_until_ready(fusion_forward(x, y, params_f32, fast_act=False))
    assert out_exact.shape == x.shape
    assert jnp.allclose(out_exact, ref, atol=1e-4, rtol=1e-4), "exact path mismatch"

    # Fast default path: tanh-GELU + EUP sigmoid (approx reciprocal).
    out_fast = jax.block_until_ready(fusion_forward(x, y, params_f32))
    assert jnp.allclose(out_fast, ref, atol=2e-2, rtol=2e-2), "fast-activation path mismatch"

    # bf16 MXU path (v6e / v7x fast matmul): bf16 weights + bf16 activation feed, f32 accumulate.
    params_bf16 = prepare_fusion_params(wr, br, wg, bg, matmul_dtype=jnp.bfloat16)
    out_bf16 = jax.block_until_ready(fusion_forward(x, y, params_bf16))
    assert out_bf16.shape == x.shape
    assert jnp.allclose(out_bf16, ref, atol=5e-2, rtol=5e-2), "bf16 path mismatch"

    print("KERNEL_OK")
</pallas_src>

<mosaic_0001>
module attributes {stable_mosaic.version = 11 : i64} {
  func.func @_fusion_kernel(%arg0: i32, %arg1: memref<8x128xf32, #tpu.memory_space<vmem>>, %arg2: memref<8x128xf32, #tpu.memory_space<vmem>>, %arg3: memref<128x256xf32, #tpu.memory_space<vmem>>, %arg4: memref<128x256xf32, #tpu.memory_space<vmem>>, %arg5: memref<1x256xf32, #tpu.memory_space<vmem>>, %arg6: memref<8x128xf32, #tpu.memory_space<vmem>>) attributes {dimension_semantics = [#tpu.dimension_semantics<parallel>], iteration_bounds = array<i64: 2>, scalar_prefetch = 0 : i64, scratch_operands = 0 : i64, tpu.core_type = #tpu.core_type<tc>, window_params = [{transform_indices = @transform_0, window_bounds = array<i64: 8, 128>}, {transform_indices = @transform_1, window_bounds = array<i64: 8, 128>}, {pipeline_mode = #tpu.pipeline_mode<synchronous>, transform_indices = @transform_2, window_bounds = array<i64: 128, 256>}, {pipeline_mode = #tpu.pipeline_mode<synchronous>, transform_indices = @transform_3, window_bounds = array<i64: 128, 256>}, {pipeline_mode = #tpu.pipeline_mode<synchronous>, transform_indices = @transform_4, window_bounds = array<i64: 1, 256>}, {transform_indices = @transform_5, window_bounds = array<i64: 8, 128>}]} {
    %c0 = arith.constant 0 : index
    %c0_0 = arith.constant 0 : index
    %0 = vector.load %arg1[%c0, %c0_0] : memref<8x128xf32, #tpu.memory_space<vmem>>, vector<8x128xf32>
    %c0_1 = arith.constant 0 : index
    %c0_2 = arith.constant 0 : index
    %1 = vector.load %arg2[%c0_1, %c0_2] : memref<8x128xf32, #tpu.memory_space<vmem>>, vector<8x128xf32>
    %c0_3 = arith.constant 0 : index
    %c0_4 = arith.constant 0 : index
    %2 = vector.load %arg3[%c0_3, %c0_4] : memref<128x256xf32, #tpu.memory_space<vmem>>, vector<128x256xf32>
    %cst = arith.constant dense<0.000000e+00> : vector<8x256xf32>
    %3 = tpu.matmul %0, %2, %cst {dimension_numbers = #tpu.dot_dimension_numbers<[1], [0], [0], [1], [0, 0, 1, 1], [], []>} : vector<8x128xf32>, vector<128x256xf32>, vector<8x256xf32> -> vector<8x256xf32>
    %c0_5 = arith.constant 0 : index
    %c0_6 = arith.constant 0 : index
    %4 = vector.load %arg4[%c0_5, %c0_6] : memref<128x256xf32, #tpu.memory_space<vmem>>, vector<128x256xf32>
    %cst_7 = arith.constant dense<0.000000e+00> : vector<8x256xf32>
    %5 = tpu.matmul %1, %4, %cst_7 {dimension_numbers = #tpu.dot_dimension_numbers<[1], [0], [0], [1], [0, 0, 1, 1], [], []>} : vector<8x128xf32>, vector<128x256xf32>, vector<8x256xf32> -> vector<8x256xf32>
    %6 = arith.addf %3, %5 : vector<8x256xf32>
    %c0_8 = arith.constant 0 : index
    %c0_9 = arith.constant 0 : index
    %7 = vector.load %arg5[%c0_8, %c0_9] : memref<1x256xf32, #tpu.memory_space<vmem>>, vector<1x256xf32>
    %8 = vector.broadcast %7 : vector<1x256xf32> to vector<8x256xf32>
    %9 = arith.addf %6, %8 : vector<8x256xf32>
    %10 = vector.extract_strided_slice %9 {offsets = [0, 0], sizes = [8, 128], strides = [1, 1]} : vector<8x256xf32> to vector<8x128xf32>
    %11 = vector.extract_strided_slice %9 {offsets = [0, 128], sizes = [8, 128], strides = [1, 1]} : vector<8x256xf32> to vector<8x128xf32>
    %cst_10 = arith.constant 5.000000e-01 : f32
    %12 = vector.broadcast %cst_10 : f32 to vector<8x128xf32>
    %13 = arith.mulf %10, %12 : vector<8x128xf32>
    %cst_11 = arith.constant 0.707106769 : f32
    %14 = vector.broadcast %cst_11 : f32 to vector<8x128xf32>
    %15 = arith.mulf %10, %14 : vector<8x128xf32>
    %16 = math.erf %15 : vector<8x128xf32>
    %cst_12 = arith.constant 1.000000e+00 : f32
    %17 = vector.broadcast %cst_12 : f32 to vector<8x128xf32>
    %18 = arith.addf %17, %16 : vector<8x128xf32>
    %19 = arith.mulf %13, %18 : vector<8x128xf32>
    %20 = arith.negf %11 : vector<8x128xf32>
    %21 = math.exp %20 : vector<8x128xf32>
    %cst_13 = arith.constant 1.000000e+00 : f32
    %22 = vector.broadcast %cst_13 : f32 to vector<8x128xf32>
    %23 = arith.addf %22, %21 : vector<8x128xf32>
    %24 = arith.divf %22, %23 : vector<8x128xf32>
    %25 = arith.subf %19, %0 : vector<8x128xf32>
    %26 = arith.mulf %24, %25 : vector<8x128xf32>
    %27 = arith.addf %0, %26 : vector<8x128xf32>
    %c0_14 = arith.constant 0 : index
    %c0_15 = arith.constant 0 : index
    %28 = vector.load %arg6[%c0_14, %c0_15] : memref<8x128xf32, #tpu.memory_space<vmem>>, vector<8x128xf32>
    tpu.vector_store %arg6[%c0_14, %c0_15], %27 {strides = array<i32>} : memref<8x128xf32, #tpu.memory_space<vmem>>, vector<8x128xf32>,
    return
  }
  func.func @transform_0(%arg0: i32) -> (i32, i32) {
    %c0_i32 = arith.constant 0 : i32
    %c0_i32_0 = arith.constant 0 : i32
    return %arg0, %c0_i32 : i32, i32
  }
  func.func @transform_1(%arg0: i32) -> (i32, i32) {
    %c0_i32 = arith.constant 0 : i32
    %c0_i32_0 = arith.constant 0 : i32
    return %arg0, %c0_i32 : i32, i32
  }
  func.func @transform_2(%arg0: i32) -> (i32, i32) {
    %c0_i32 = arith.constant 0 : i32
    %c0_i32_0 = arith.constant 0 : i32
    %c0_i32_1 = arith.constant 0 : i32
    return %c0_i32, %c0_i32_0 : i32, i32
  }
  func.func @transform_3(%arg0: i32) -> (i32, i32) {
    %c0_i32 = arith.constant 0 : i32
    %c0_i32_0 = arith.constant 0 : i32
    %c0_i32_1 = arith.constant 0 : i32
    return %c0_i32, %c0_i32_0 : i32, i32
  }
  func.func @transform_4(%arg0: i32) -> (i32, i32) {
    %c0_i32 = arith.constant 0 : i32
    %c0_i32_0 = arith.constant 0 : i32
    %c0_i32_1 = arith.constant 0 : i32
    return %c0_i32, %c0_i32_0 : i32, i32
  }
  func.func @transform_5(%arg0: i32) -> (i32, i32) {
    %c0_i32 = arith.constant 0 : i32
    %c0_i32_0 = arith.constant 0 : i32
    return %arg0, %c0_i32 : i32, i32
  }
}

module attributes {stable_mosaic.version = 11 : i64} {
  func.func @_fusion_kernel(%arg0: i32, %arg1: memref<8x128xf32, #tpu.memory_space<vmem>>, %arg2: memref<8x128xf32, #tpu.memory_space<vmem>>, %arg3: memref<128x256xf32, #tpu.memory_space<vmem>>, %arg4: memref<128x256xf32, #tpu.memory_space<vmem>>, %arg5: memref<1x256xf32, #tpu.memory_space<vmem>>, %arg6: memref<8x128xf32, #tpu.memory_space<vmem>>) attributes {dimension_semantics = [#tpu.dimension_semantics<parallel>], iteration_bounds = array<i64: 2>, scalar_prefetch = 0 : i64, scratch_operands = 0 : i64, tpu.core_type = #tpu.core_type<tc>, window_params = [{transform_indices = @transform_0, window_bounds = array<i64: 8, 128>}, {transform_indices = @transform_1, window_bounds = array<i64: 8, 128>}, {pipeline_mode = #tpu.pipeline_mode<synchronous>, transform_indices = @transform_2, window_bounds = array<i64: 128, 256>}, {pipeline_mode = #tpu.pipeline_mode<synchronous>, transform_indices = @transform_3, window_bounds = array<i64: 128, 256>}, {pipeline_mode = #tpu.pipeline_mode<synchronous>, transform_indices = @transform_4, window_bounds = array<i64: 1, 256>}, {transform_indices = @transform_5, window_bounds = array<i64: 8, 128>}]} {
    %c0 = arith.constant 0 : index
    %c0_0 = arith.constant 0 : index
    %0 = vector.load %arg1[%c0, %c0_0] : memref<8x128xf32, #tpu.memory_space<vmem>>, vector<8x128xf32>
    %c0_1 = arith.constant 0 : index
    %c0_2 = arith.constant 0 : index
    %1 = vector.load %arg2[%c0_1, %c0_2] : memref<8x128xf32, #tpu.memory_space<vmem>>, vector<8x128xf32>
    %c0_3 = arith.constant 0 : index
    %c0_4 = arith.constant 0 : index
    %2 = vector.load %arg3[%c0_3, %c0_4] : memref<128x256xf32, #tpu.memory_space<vmem>>, vector<128x256xf32>
    %cst = arith.constant dense<0.000000e+00> : vector<8x256xf32>
    %3 = tpu.matmul %0, %2, %cst {dimension_numbers = #tpu.dot_dimension_numbers<[1], [0], [0], [1], [0, 0, 1, 1], [], []>} : vector<8x128xf32>, vector<128x256xf32>, vector<8x256xf32> -> vector<8x256xf32>
    %c0_5 = arith.constant 0 : index
    %c0_6 = arith.constant 0 : index
    %4 = vector.load %arg4[%c0_5, %c0_6] : memref<128x256xf32, #tpu.memory_space<vmem>>, vector<128x256xf32>
    %cst_7 = arith.constant dense<0.000000e+00> : vector<8x256xf32>
    %5 = tpu.matmul %1, %4, %cst_7 {dimension_numbers = #tpu.dot_dimension_numbers<[1], [0], [0], [1], [0, 0, 1, 1], [], []>} : vector<8x128xf32>, vector<128x256xf32>, vector<8x256xf32> -> vector<8x256xf32>
    %6 = arith.addf %3, %5 : vector<8x256xf32>
    %c0_8 = arith.constant 0 : index
    %c0_9 = arith.constant 0 : index
    %7 = vector.load %arg5[%c0_8, %c0_9] : memref<1x256xf32, #tpu.memory_space<vmem>>, vector<1x256xf32>
    %8 = vector.broadcast %7 : vector<1x256xf32> to vector<8x256xf32>
    %9 = arith.addf %6, %8 : vector<8x256xf32>
    %10 = vector.extract_strided_slice %9 {offsets = [0, 0], sizes = [8, 128], strides = [1, 1]} : vector<8x256xf32> to vector<8x128xf32>
    %11 = vector.extract_strided_slice %9 {offsets = [0, 128], sizes = [8, 128], strides = [1, 1]} : vector<8x256xf32> to vector<8x128xf32>
    %cst_10 = arith.constant 5.000000e-01 : f32
    %12 = vector.broadcast %cst_10 : f32 to vector<8x128xf32>
    %13 = arith.mulf %10, %12 : vector<8x128xf32>
    %cst_11 = arith.constant 0.707106769 : f32
    %14 = vector.broadcast %cst_11 : f32 to vector<8x128xf32>
    %15 = arith.mulf %10, %14 : vector<8x128xf32>
    %16 = math.erf %15 : vector<8x128xf32>
    %cst_12 = arith.constant 1.000000e+00 : f32
    %17 = vector.broadcast %cst_12 : f32 to vector<8x128xf32>
    %18 = arith.addf %17, %16 : vector<8x128xf32>
    %19 = arith.mulf %13, %18 : vector<8x128xf32>
    %20 = arith.negf %11 : vector<8x128xf32>
    %21 = math.exp %20 : vector<8x128xf32>
    %cst_13 = arith.constant 1.000000e+00 : f32
    %22 = vector.broadcast %cst_13 : f32 to vector<8x128xf32>
    %23 = arith.addf %22, %21 : vector<8x128xf32>
    %24 = arith.divf %22, %23 : vector<8x128xf32>
    %25 = arith.subf %19, %0 : vector<8x128xf32>
    %26 = arith.mulf %24, %25 : vector<8x128xf32>
    %27 = arith.addf %0, %26 : vector<8x128xf32>
    %c0_14 = arith.constant 0 : index
    %c0_15 = arith.constant 0 : index
    %28 = vector.load %arg6[%c0_14, %c0_15] : memref<8x128xf32, #tpu.memory_space<vmem>>, vector<8x128xf32>
    tpu.vector_store %arg6[%c0_14, %c0_15], %27 {strides = array<i32>} : memref<8x128xf32, #tpu.memory_space<vmem>>, vector<8x128xf32>,
    return
  }
  func.func @transform_0(%arg0: i32) -> (i32, i32) {
    %c0_i32 = arith.constant 0 : i32
    %c0_i32_0 = arith.constant 0 : i32
    return %arg0, %c0_i32 : i32, i32
  }
  func.func @transform_1(%arg0: i32) -> (i32, i32) {
    %c0_i32 = arith.constant 0 : i32
    %c0_i32_0 = arith.constant 0 : i32
    return %arg0, %c0_i32 : i32, i32
  }
  func.func @transform_2(%arg0: i32) -> (i32, i32) {
    %c0_i32 = arith.constant 0 : i32
    %c0_i32_0 = arith.constant 0 : i32
    %c0_i32_1 = arith.constant 0 : i32
    return %c0_i32, %c0_i32_0 : i32, i32
  }
  func.func @transform_3(%arg0: i32) -> (i32, i32) {
    %c0_i32 = arith.constant 0 : i32
    %c0_i32_0 = arith.constant 0 : i32
    %c0_i32_1 = arith.constant 0 : i32
    return %c0_i32, %c0_i32_0 : i32, i32
  }
  func.func @transform_4(%arg0: i32) -> (i32, i32) {
    %c0_i32 = arith.constant 0 : i32
    %c0_i32_0 = arith.constant 0 : i32
    %c0_i32_1 = arith.constant 0 : i32
    return %c0_i32, %c0_i32_0 : i32, i32
  }
  func.func @transform_5(%arg0: i32) -> (i32, i32) {
    %c0_i32 = arith.constant 0 : i32
    %c0_i32_0 = arith.constant 0 : i32
    return %arg0, %c0_i32 : i32, i32
  }
}

</mosaic_0001>

<bundles_post_ra>
// kernel: tpu_custom_call.1
= control target key start
LH: loop header
LB: loop body
LE: loop exit
PB: predicated region body
PF: predicated region fallthrough
CT: control target
= control target key end

     0   :  { %s1351_s0 = inlined_call_operand.hbm [shape: f32[16,128], index: 0, kind: input, shape index: {}]   ;;  %s1352_s1 = inlined_call_operand.hbm [shape: f32[16,128], index: 1, kind: input, shape index: {}]   ;;  %s1353_s2 = inlined_call_operand.hbm [shape: f32[128,256], index: 2, kind: input, shape index: {}]   ;;  %s1354_s3 = inlined_call_operand.hbm [shape: f32[128,256], index: 3, kind: input, shape index: {}]   ;;  %s1355_s4 = inlined_call_operand.vmem [shape: f32[1,256], index: 4, kind: input, shape index: {}]   ;;  %s1356_s5 = inlined_call_operand.hbm [shape: f32[16,128], index: 5, kind: output, shape index: {}]  }
   0x1   :  { %1361 = sst [smem:[#allocation16_spill]] %s1353_s2 }
   0x2   :  { %1362 = sst [smem:[#allocation17_spill]] %s1354_s3 }
   0x3   :  { %10 = vsyncpa [#allocation3], 0 }
   0x4   :  { %12 = vsyncpa [#allocation3 + $0x1], 0 }
   0x5   :  { %13 = vsyncpa [#allocation6], 0 }
   0x6   :  { %15 = vsyncpa [#allocation6 + $0x1], 0 }
   0x7   :  { %16 = vsyncpa [#allocation9], 0 }
   0x8   :  { %17 = vsyncpa [#allocation4], 0 }
   0x9   :  { %19 = vsyncpa [#allocation4 + $0x1], 0  ;;  %s1070_s18 = smov 0   ;;  %s1072_s19 = smov 0  }
   0xa   :  { %s1074_s20 = smov 0   ;;  %s1076_s21 = smov 0  }
   0xb LB: > { %s1091_s22 = sadd.s32 4294967295, %s1030_s21   ;;  %s669_s23 = sadd.s32 4294967294, %s1030_s21   ;;  %s1030_s21 = sphi %s1076_s21, %s1384_s21   ;;  %s1026_s20 = sphi %s1074_s20, %s1383_s20   ;;  %s1022_s19 = sphi %s1072_s19, %s1382_s19   ;;  %s1018_s18 = sphi %s1070_s18, %s1381_s18  }
   0xc   : > { %p45_p0 = scmp.ne.s32.totalorder %s1022_s19, %s1018_s18  ;;  %p1357_p1 = scmp.eq.s32.totalorder %s1091_s22, 0 }
   0xd   : > { %p164_p3 = scmp.eq.s32.totalorder %s669_s23, 1  ;;  %p670_p5 = scmp.ge.s32.totalorder %s1030_s21, 1 }
   0xe   : > { %p1100_p4 = por %p1357_p1, %p45_p0  ;;  %p171_p7 = scmp.lt.s32.totalorder %s1030_s21, 3 }
   0xf   : > { %p1105_p6 = por %p164_p3, %p45_p0  ;;  %s1032_s27 = smov [#allocation7]  }
  0x10   : > { %s1363_s24 = scalar_select %p1100_p4, 1, 0 }
  0x11   : > { %s1364_s25 = scalar_select %p1105_p6, 1, 0 }
  0x12   : > { %p1110_p8 = pnand %p670_p5, %p171_p7  ;;  %s183_s28 = sshll.u32 %s1032_s27, 4  ;;  %s1114_s28 = int_to_ptr.vmem [resolvable:$true] %s183_s28 }
  0x13   : > { %s1033_s30 = smov [#allocation8]   ;;  %s1367_s2 = sld [smem:[#allocation16_spill]] }
  0x14   : > { %s1365_s26 = scalar_select %p1110_p8, 1, 0 }
  0x15   : > { %p769_p9 = pneg %p1110_p8  ;;  %s196_s6 = sshll.u32 %s1033_s30, 4  ;;  %s1125_s6 = int_to_ptr.vmem [resolvable:$true] %s196_s6 }
  0x17   : > { %p1121_p11 = pnand %p769_p9, %p1357_p1 }
  0x19   : > { %s836_s9 = scalar_lea.hbm %s1367_s2, 4096  ;;  %p838_p13 = pneg %p1121_p11 }
  0x1a   : > { %p837_p12 = scmp.ne.s32.totalorder %s1367_s2, %s836_s9  ;;  %p843_p5 = scmp.lt.u32.totalorder %s836_s9, %s1367_s2 }
  0x1c   : > { %p839_p0 = pnand %p838_p13, %p837_p12 }
  0x1e   : > { %p840_p3 = pneg %p839_p0 }
  0x20   : > { %p845_p7 = pnand %p843_p5, %p840_p3 }
  0x22   : > { %848 = shalt.err (!%p845_p7)
}
  0x23   : > { %s849_s14 = scalar_lea.vmem %s1114_s28, 4096  ;;  %p857_p2 = scmp.lt.s32.totalorder %s1114_s28, %s1114_s28 }
  0x24   : > { %p850_p9 = scmp.ne.s32.totalorder %s1114_s28, %s849_s14  ;;  %p858_p12 = scmp.lt.s32.totalorder %s849_s14, %s849_s14 }
  0x26   : > { %p852_p10 = pnand %p850_p9, %p838_p13  ;;  %p859_p0 = por %p858_p12, %p857_p2 }
  0x28   : > { %p853_p1 = pneg %p852_p10 }
  0x2a   : > { %p860_p6 = pnand %p859_p0, %p853_p1 }
  0x2c   : > { %863 = shalt.err (!%p860_p6)
}
  0x2d   : > { %s1034_s15 = smov 256   ;;  %s1035_s16 = smov 16  }
  0x2e   : > { %772 = dma.hbm_to_vmem [thread:$0]  (!%p1121_p11), %s1367_s2, 4096, %s1114_s28, [#allocation6], %s1034_s15, %s1034_s15, %s1035_s16  }
  0x2f   : > { %s1368_s3 = sld [smem:[#allocation17_spill]] }
  0x35   : > { %s864_s7 = scalar_lea.hbm %s1368_s3, 4096 }
  0x36   : > { %p865_p2 = scmp.ne.s32.totalorder %s1368_s3, %s864_s7  ;;  %p871_p10 = scmp.lt.u32.totalorder %s864_s7, %s1368_s3 }
  0x38   : > { %p867_p1 = pnand %p865_p2, %p838_p13 }
  0x3a   : > { %p868_p6 = pneg %p867_p1 }
  0x3c   : > { %p873_p3 = pnand %p871_p10, %p868_p6 }
  0x3e   : > { %876 = shalt.err (!%p873_p3)
}
  0x3f   : > { %s877_s28 = scalar_lea.vmem %s1125_s6, 4096  ;;  %p885_p12 = scmp.lt.s32.totalorder %s1125_s6, %s1125_s6 }
  0x40   : > { %p878_p5 = scmp.ne.s32.totalorder %s1125_s6, %s877_s28  ;;  %p886_p0 = scmp.lt.s32.totalorder %s877_s28, %s877_s28 }
  0x42   : > { %p880_p7 = pnand %p878_p5, %p838_p13  ;;  %p887_p2 = por %p886_p0, %p885_p12 }
  0x44   : > { %p881_p9 = pneg %p880_p7 }
  0x46   : > { %p888_p1 = pnand %p887_p2, %p881_p9 }
  0x48   : > { %891 = shalt.err (!%p888_p1)
}
  0x49   : > { %775 = dma.hbm_to_vmem [thread:$0]  (!%p1121_p11), %s1368_s3, 4096, %s1125_s6, [#allocation9], %s1034_s15, %s1034_s15, %s1035_s16  }
  0x4a   : > { %s1180_s14 = sadd.s32 1, %s1030_s21   ;;  %s32_s29 = sadd.s32 1, %s1026_s20 }
  0x4b   : > { %s29_s17 = ssub.s32 %s1030_s21, %s1180_s14  ;;  %p39_p13 = scmp.ne.s32.totalorder %s1026_s20, %s1022_s19 }
  0x4c   : > { %p30_p6 = scmp.eq.s32.totalorder %s29_s17, 0  ;;  %p40_p10 = scmp.eq.s32.totalorder %s1030_s21, 0 }
  0x4d   : > { %p1369_p3 = scmp.eq.s32.totalorder %s1091_s22, 1  ;;  %p789_p7 = scmp.lt.s32.totalorder %s1030_s21, 2 }
  0x4e   : > { %s1196_s27 = scalar_select %p30_p6, %s1026_s20, %s32_s29  }
  0x4f   : > { %p1190_p5 = por %p1369_p3, %p39_p13  ;;  %p41_p9 = por %p40_p10, %p39_p13 }
  0x50   : > { %s213_s30 = sand.u32 1, %s1026_s20   ;;  %s675_s15 = sshll.u32 %s1030_s21, 7 }
  0x51   : > { %s1370_s23 = scalar_select %p1190_p5, 1, 0 }
  0x52   : > { %s1199_s6 = sshll.u32 %s213_s30, 3  ;;  %s1205_s8 = scalar_lea.hbm %s1351_s0, %s675_s15 }
  0x53   : > { %s217_s9 = scalar_lea.vmem [#allocation2], %s1199_s6  ;;  %p1210_p11 = pnand %p789_p7, %p41_p9 }
  0x54   : > { %s224_s10 = sshll.u32 %s217_s9, 4  ;;  %s1217_s13 = scalar_lea.hbm %s1352_s1, %s675_s15  ;;  %s1208_s10 = int_to_ptr.vmem [resolvable:$true] %s224_s10 }
  0x55   : > { %s231_s29 = sand.u32 1, %s1030_s21   ;;  %s214_s17 = scalar_lea.sflag [#allocation3], %s213_s30 }
  0x56   : > { %s892_s16 = scalar_lea.hbm %s1205_s8, 128  ;;  %p894_p0 = pneg %p1210_p11 }
  0x57   : > { %p893_p12 = scmp.ne.s32.totalorder %s1205_s8, %s892_s16  ;;  %s897_s2 = scalar_lea.hbm %s1351_s0, 256 }
  0x58   : > { %p898_p13 = scmp.lt.u32.totalorder %s1205_s8, %s1351_s0  ;;  %p899_p6 = scmp.lt.u32.totalorder %s897_s2, %s892_s16 }
  0x59   : > { %p895_p2 = pnand %p894_p0, %p893_p12  ;;  %p901_p3 = scmp.lt.u32.totalorder %s892_s16, %s1205_s8 }
  0x5a   : > { %p900_p10 = por %p899_p6, %p898_p13 }
  0x5b   : > { %p896_p1 = pneg %p895_p2 }
  0x5c   : > { %p902_p7 = por %p901_p3, %p900_p10 }
  0x5e   : > { %p903_p9 = pnand %p902_p7, %p896_p1 }
  0x60   : > { %906 = shalt.err (!%p903_p9)
}
  0x61   : > { %s907_s30 = scalar_lea.vmem %s1208_s10, 128  ;;  %s1036_s15 = smov [#allocation2]  }
  0x62   : > { %p908_p12 = scmp.ne.s32.totalorder %s1208_s10, %s907_s30  ;;  %s912_s12 = sshll.u32 %s1036_s15, 4  ;;  %s913_s12 = int_to_ptr.vmem [resolvable:$false] %s912_s12 }
  0x63   : > { %s914_s3 = scalar_lea.vmem %s913_s12, 256  ;;  %p915_p4 = scmp.lt.s32.totalorder %s1208_s10, %s913_s12 }
  0x64   : > { %p910_p2 = pnand %p908_p12, %p894_p0  ;;  %p916_p13 = scmp.lt.s32.totalorder %s914_s3, %s907_s30 }
  0x66   : > { %p911_p5 = pneg %p910_p2  ;;  %p917_p6 = por %p916_p13, %p915_p4 }
  0x68   : > { %p918_p10 = pnand %p917_p6, %p911_p5 }
  0x6a   : > { %921 = shalt.err (!%p918_p10)
}
  0x6b   : > { %779 = dma.hbm_to_vmem [thread:$0]  (!%p1210_p11), %s1205_s8, 128, %s1208_s10, %s214_s17  }
  0x6c   : > { %s235_s2 = scalar_lea.vmem [#allocation5], %s1199_s6  ;;  %s232_s7 = scalar_lea.sflag [#allocation6], %s231_s29 }
  0x6d   : > { %s242_s16 = sshll.u32 %s235_s2, 4  ;;  %s922_s9 = scalar_lea.hbm %s1217_s13, 128  ;;  %s243_s16 = int_to_ptr.vmem [resolvable:$true] %s242_s16 }
  0x6e   : > { %p923_p4 = scmp.ne.s32.totalorder %s1217_s13, %s922_s9  ;;  %s927_s15 = scalar_lea.hbm %s1352_s1, 256 }
  0x6f   : > { %p928_p3 = scmp.lt.u32.totalorder %s1217_s13, %s1352_s1  ;;  %p929_p7 = scmp.lt.u32.totalorder %s927_s15, %s922_s9 }
  0x70   : > { %p925_p5 = pnand %p923_p4, %p894_p0  ;;  %p931_p12 = scmp.lt.u32.totalorder %s922_s9, %s1217_s13 }
  0x71   : > { %p930_p9 = por %p929_p7, %p928_p3 }
  0x72   : > { %p926_p1 = pneg %p925_p5 }
  0x73   : > { %p932_p2 = por %p931_p12, %p930_p9 }
  0x75   : > { %p933_p13 = pnand %p932_p2, %p926_p1 }
  0x77   : > { %936 = shalt.err (!%p933_p13)
}
  0x78   : > { %s937_s6 = scalar_lea.vmem %s243_s16, 128  ;;  %s1037_s8 = smov [#allocation5]  }
  0x79   : > { %p938_p6 = scmp.ne.s32.totalorder %s243_s16, %s937_s6  ;;  %s942_s10 = sshll.u32 %s1037_s8, 4  ;;  %s943_s10 = int_to_ptr.vmem [resolvable:$false] %s942_s10 }
  0x7a   : > { %s944_s29 = scalar_lea.vmem %s943_s10, 256  ;;  %p945_p5 = scmp.lt.s32.totalorder %s243_s16, %s943_s10 }
  0x7b   : > { %p940_p10 = pnand %p938_p6, %p894_p0  ;;  %p946_p8 = scmp.lt.s32.totalorder %s944_s29, %s937_s6 }
  0x7d   : > { %p941_p4 = pneg %p940_p10  ;;  %p947_p3 = por %p946_p8, %p945_p5 }
  0x7f   : > { %p948_p7 = pnand %p947_p3, %p941_p4 }
  0x81   : > { %951 = shalt.err (!%p948_p7)
}
  0x82   : > { %782 = dma.hbm_to_vmem [thread:$0]  (!%p1210_p11), %s1217_s13, 128, %s243_s16, %s232_s7  }
  0x83   : > { %p1372_p1 = scmp.ne.s32.totalorder %s1365_s26, 0 }
  0x84   : > { %s1270_s17 = sand.u32 (!%p1372_p1), 1, %s1022_s19   ;;  %p1373_p8 = scmp.ne.s32.totalorder (!%p1372_p1), %s1363_s24, 0 }
  0x85   : > { %251 = sbr.rel (%p1372_p1) target bundleno = 449 (0x1c1), region = 40  ;;  %s1273_s2 = sshll.u32 (!%p1372_p1), %s1270_s17, 3 }
  0x86   : > { %s254_s9 = scalar_lea.sflag (!%p1372_p1), [#allocation3], %s1270_s17  ;;  %s257_s28 = scalar_lea.vmem (!%p1372_p1), [#allocation2], %s1273_s2 }
  0x8c   : > { %997 = dma.done.wait (%p1373_p8), %s254_s9, 128  }
  0x8d   : > { %999 = vsyncadd (%p1373_p8), %s254_s9, 4294967168  ;;  %s262_s26 = sand.u32 1, %s1091_s22   ;;  %s266_s13 = scalar_lea.vmem [#allocation5], %s1273_s2 }
  0x8e   : > { %s263_s11 = scalar_lea.sflag [#allocation6], %s262_s26 }
  0x8f   : > { %1001 = dma.done.wait (%p1373_p8), %s263_s11, 128  }
  0x90   : > { %1003 = vsyncadd (%p1373_p8), %s263_s11, 4294967168  ;;  %p1374_p11 = scmp.eq.s32.totalorder %s1091_s22, 0 }
  0x92   : > { %1005 = dma.done.wait (%p1374_p11), [#allocation6], 4096   ;;  %p1375_p0 = pmov %p1374_p11 }
  0x94   : > { %1007 = vsyncadd (%p1375_p0), [#allocation6], 4294963200  ;;  %p1376_p9 = pmov %p1375_p0 }
  0x95   : > { %p1377_p12 = pmov %p1375_p0 }
  0x96   : > { %1009 = dma.done.wait (%p1376_p9), [#allocation9], 4096  }
  0x97   : > { %1011 = vsyncadd (%p1377_p12), [#allocation9], 4294963200  ;;  %v1038_v0 = vmov 0.0   ;;  %v341_v1 = vld [vmem:[#allocation8 + $0x8] sm:$0xff]  ;;  %v343_v2 = vld [vmem:[#allocation8 + $0x18] sm:$0xff]  ;;  %s686_s7 = sshll.u32 %s1091_s22, 7 }
  0x98   : > { %436 = vmatprep.mubr.f32.mxu1 %v1038_v0  ;;  %507 = vmatprep.mubr.f32.mxu0 %v1038_v0  ;;  %v309_v3 = vld [vmem:[#allocation7 + $0x8] sm:$0xff]  ;;  %v689_v4 = vpack.c.bf16 %v343_v2, %v341_v1  ;;  %v311_v5 = vld [vmem:[#allocation7 + $0x18] sm:$0xff]  ;;  %v340_v6 = vld [vmem:[#allocation8] sm:$0xff]  ;;  %s305_s30 = scalar_lea.vmem [#allocation10], %s1273_s2  ;;  %s1307_s6 = scalar_lea.hbm %s1356_s5, %s686_s7 }
  0x99   : > { %v342_v7 = vld [vmem:[#allocation8 + $0x10] sm:$0xff]  ;;  %v721_v8 = vpack.c.bf16 %v311_v5, %v309_v3  ;;  %v308_v10 = vld [vmem:[#allocation7] sm:$0xff]  ;;  %v345_v12 = vld [vmem:[#allocation8 + $0x28] sm:$0xff]  ;;  %s557_s15 = sshll.u32 %s305_s30, 4  ;;  %s544_s8 = scalar_lea.sflag [#allocation4], %s1270_s17  ;;  %s1309_s15 = int_to_ptr.vmem [resolvable:$true] %s557_s15 }
  0x9a   : > { %v691_v9 = vpack.c.bf16 %v342_v7, %v340_v6  ;;  %v310_v11 = vld [vmem:[#allocation7 + $0x10] sm:$0xff]  ;;  %690 = vmatprep.subr.bf16.mxu1 %v689_v4  ;;  %v347_v14 = vld [vmem:[#allocation8 + $0x38] sm:$0xff]  ;;  %v313_v15 = vld [vmem:[#allocation7 + $0x28] sm:$0xff]  ;;  %s952_s10 = scalar_lea.vmem %s1309_s15, 128  ;;  %p1378_p13 = scmp.ne.s32.totalorder %s1370_s23, 0 }
  0x9b   : > { %v723_v13 = vpack.c.bf16 %v310_v11, %v308_v10  ;;  %v315_v16 = vld [vmem:[#allocation7 + $0x38] sm:$0xff]  ;;  %722 = vmatprep.subr.bf16.mxu0 %v721_v8  ;;  %v693_v17 = vpack.c.bf16 %v347_v14, %v345_v12  ;;  %v344_v19 = vld [vmem:[#allocation8 + $0x20] sm:$0xff]  ;;  %v346_v20 = vld [vmem:[#allocation8 + $0x30] sm:$0xff]  ;;  %p953_p2 = scmp.ne.s32.totalorder %s1309_s15, %s952_s10  ;;  %s1039_s22 = smov [#allocation10]  }
  0x9c   : > { %692 = vmatpush1.bf16.msra.mxu1 %v691_v9  ;;  %v725_v18 = vpack.c.bf16 %v315_v16, %v313_v15  ;;  %v312_v21 = vld [vmem:[#allocation7 + $0x20] sm:$0xff]  ;;  %v695_v22 = vpack.c.bf16 %v346_v20, %v344_v19  ;;  %v314_v23 = vld [vmem:[#allocation7 + $0x30] sm:$0xff]  ;;  %v349_v24 = vld [vmem:[#allocation8 + $0x48] sm:$0xff]  ;;  %s956_s29 = sshll.u32 %s1039_s22, 4  ;;  %s957_s29 = int_to_ptr.vmem [resolvable:$false] %s956_s29 }
  0x9d   : > { %724 = vmatpush1.bf16.msra.mxu0 %v723_v13  ;;  %v351_v25 = vld [vmem:[#allocation8 + $0x58] sm:$0xff]  ;;  %694 = vmatprep.subr.bf16.mxu1 %v693_v17  ;;  %v727_v26 = vpack.c.bf16 %v314_v23, %v312_v21  ;;  %v317_v28 = vld [vmem:[#allocation7 + $0x48] sm:$0xff]  ;;  %v348_v30 = vld [vmem:[#allocation8 + $0x40] sm:$0xff]  ;;  %p954_p6 = pnand %p953_p2, %p1378_p13  ;;  %s958_s2 = scalar_lea.vmem %s957_s29, 256 }
  0x9e   : > { %726 = vmatprep.subr.bf16.mxu0 %v725_v18  ;;  %v697_v27 = vpack.c.bf16 %v351_v25, %v349_v24  ;;  %v319_v29 = vld [vmem:[#allocation7 + $0x58] sm:$0xff]  ;;  %v350_v32 = vld [vmem:[#allocation8 + $0x50] sm:$0xff]  ;;  %v316_v33 = vld [vmem:[#allocation7 + $0x40] sm:$0xff]  ;;  %p959_p4 = scmp.lt.s32.totalorder %s1309_s15, %s957_s29  ;;  %p960_p5 = scmp.lt.s32.totalorder %s958_s2, %s952_s10 }
  0x9f   : > { %v729_v31 = vpack.c.bf16 %v319_v29, %v317_v28  ;;  %v318_v34 = vld [vmem:[#allocation7 + $0x50] sm:$0xff]  ;;  %v699_v35 = vpack.c.bf16 %v350_v32, %v348_v30  ;;  %v353_v36 = vld [vmem:[#allocation8 + $0x68] sm:$0xff]  ;;  %v355_v37 = vld [vmem:[#allocation8 + $0x78] sm:$0xff]  ;;  %p955_p10 = pneg %p954_p6 }
  0xa0   : > { %696 = vmatpush1.bf16.msra.mxu1 %v695_v22  ;;  %v321_v38 = vld [vmem:[#allocation7 + $0x68] sm:$0xff]  ;;  %v731_v39 = vpack.c.bf16 %v318_v34, %v316_v33  ;;  %v701_v40 = vpack.c.bf16 %v355_v37, %v353_v36  ;;  %v323_v41 = vld [vmem:[#allocation7 + $0x78] sm:$0xff]  ;;  %v352_v42 = vld [vmem:[#allocation8 + $0x60] sm:$0xff]  ;;  %p961_p3 = por %p960_p5, %p959_p4 }
  0xa1   : > { %728 = vmatpush1.bf16.msra.mxu0 %v727_v26  ;;  %698 = vmatprep.subr.bf16.mxu1 %v697_v27  ;;  %v354_v43 = vld [vmem:[#allocation8 + $0x70] sm:$0xff]  ;;  %v733_v44 = vpack.c.bf16 %v323_v41, %v321_v38  ;;  %v320_v45 = vld [vmem:[#allocation7 + $0x60] sm:$0xff]  ;;  %v357_v47 = vld [vmem:[#allocation8 + $0x88] sm:$0xff] }
  0xa2   : > { %730 = vmatprep.subr.bf16.mxu0 %v729_v31  ;;  %v322_v46 = vld [vmem:[#allocation7 + $0x70] sm:$0xff]  ;;  %v359_v48 = vld [vmem:[#allocation8 + $0x98] sm:$0xff]  ;;  %v325_v49 = vld [vmem:[#allocation7 + $0x88] sm:$0xff]  ;;  %v703_v51 = vpack.c.bf16 %v354_v43, %v352_v42  ;;  %p962_p7 = pnand %p961_p3, %p955_p10 }
  0xa3   : > { %v327_v50 = vld [vmem:[#allocation7 + $0x98] sm:$0xff]  ;;  %v735_v52 = vpack.c.bf16 %v322_v46, %v320_v45  ;;  %v705_v53 = vpack.c.bf16 %v359_v48, %v357_v47  ;;  %v356_v54 = vld [vmem:[#allocation8 + $0x80] sm:$0xff]  ;;  %v358_v55 = vld [vmem:[#allocation8 + $0x90] sm:$0xff] }
  0xa4   : > { %700 = vmatpush1.bf16.msra.mxu1 %v699_v35  ;;  %v324_v56 = vld [vmem:[#allocation7 + $0x80] sm:$0xff]  ;;  %v737_v57 = vpack.c.bf16 %v327_v50, %v325_v49  ;;  %v326_v58 = vld [vmem:[#allocation7 + $0x90] sm:$0xff]  ;;  %v361_v59 = vld [vmem:[#allocation8 + $0xa8] sm:$0xff]  ;;  %v707_v63 = vpack.c.bf16 %v358_v55, %v356_v54  ;;  %v516_v35 = vlaneseq }
  0xa5   : > { %732 = vmatpush1.bf16.msra.mxu0 %v731_v39  ;;  %702 = vmatprep.subr.bf16.mxu1 %v701_v40  ;;  %v363_v60 = vld [vmem:[#allocation8 + $0xb8] sm:$0xff]  ;;  %v329_v61 = vld [vmem:[#allocation7 + $0xa8] sm:$0xff]  ;;  %v739_v0 = vpack.c.bf16 %v326_v58, %v324_v56  ;;  %v360_v2 = vld [vmem:[#allocation8 + $0xa0] sm:$0xff] }
  0xa6   : > { %734 = vmatprep.subr.bf16.mxu0 %v733_v44  ;;  %v331_v62 = vld [vmem:[#allocation7 + $0xb8] sm:$0xff]  ;;  %v709_v1 = vpack.c.bf16 %v363_v60, %v361_v59  ;;  %v362_v3 = vld [vmem:[#allocation8 + $0xb0] sm:$0xff]  ;;  %v328_v4 = vld [vmem:[#allocation7 + $0xa0] sm:$0xff]  ;;  %v517_v36 = vshrl.u32 %v516_v35, 7 }
  0xa7   : > { %v741_v5 = vpack.c.bf16 %v331_v62, %v329_v61  ;;  %v330_v6 = vld [vmem:[#allocation7 + $0xb0] sm:$0xff]  ;;  %v365_v7 = vld [vmem:[#allocation8 + $0xc8] sm:$0xff]  ;;  %v367_v8 = vld [vmem:[#allocation8 + $0xd8] sm:$0xff]  ;;  %v711_v11 = vpack.c.bf16 %v362_v3, %v360_v2 }
  0xa8   : > { %704 = vmatpush1.bf16.msra.mxu1 %v703_v51  ;;  %v333_v9 = vld [vmem:[#allocation7 + $0xc8] sm:$0xff]  ;;  %v335_v10 = vld [vmem:[#allocation7 + $0xd8] sm:$0xff]  ;;  %v743_v12 = vpack.c.bf16 %v330_v6, %v328_v4  ;;  %v713_v13 = vpack.c.bf16 %v367_v8, %v365_v7  ;;  %v364_v14 = vld [vmem:[#allocation8 + $0xc0] sm:$0xff]  ;;  %v518_v37 = vsub.s32 0, %v517_v36  ;;  %v522_v39 = vsub.s32 1, %v517_v36 }
  0xa9   : > { %736 = vmatpush1.bf16.msra.mxu0 %v735_v52  ;;  %706 = vmatprep.subr.bf16.mxu1 %v705_v53  ;;  %v366_v15 = vld [vmem:[#allocation8 + $0xd0] sm:$0xff]  ;;  %v332_v16 = vld [vmem:[#allocation7 + $0xc0] sm:$0xff]  ;;  %v745_v17 = vpack.c.bf16 %v335_v10, %v333_v9  ;;  %v369_v19 = vld [vmem:[#allocation8 + $0xe8] sm:$0xff] }
  0xaa   : > { %738 = vmatprep.subr.bf16.mxu0 %v737_v57  ;;  %v334_v18 = vld [vmem:[#allocation7 + $0xd0] sm:$0xff]  ;;  %v371_v20 = vld [vmem:[#allocation8 + $0xf8] sm:$0xff]  ;;  %v337_v21 = vld [vmem:[#allocation7 + $0xe8] sm:$0xff]  ;;  %v715_v23 = vpack.c.bf16 %v366_v15, %v364_v14 }
  0xab   : > { %v339_v22 = vld [vmem:[#allocation7 + $0xf8] sm:$0xff]  ;;  %v747_v24 = vpack.c.bf16 %v334_v18, %v332_v16  ;;  %v717_v25 = vpack.c.bf16 %v371_v20, %v369_v19  ;;  %v368_v26 = vld [vmem:[#allocation8 + $0xe0] sm:$0xff]  ;;  %v370_v27 = vld [vmem:[#allocation8 + $0xf0] sm:$0xff] }
  0xac   : > { %708 = vmatpush1.bf16.msra.mxu1 %v707_v63  ;;  %v749_v28 = vpack.c.bf16 %v339_v22, %v337_v21  ;;  %v336_v29 = vld [vmem:[#allocation7 + $0xe0] sm:$0xff]  ;;  %v338_v30 = vld [vmem:[#allocation7 + $0xf0] sm:$0xff]  ;;  %v719_v31 = vpack.c.bf16 %v370_v27, %v368_v26 }
  0xad   : > { %740 = vmatpush1.bf16.msra.mxu0 %v739_v0  ;;  %710 = vmatprep.subr.bf16.mxu1 %v709_v1  ;;  %v751_v32 = vpack.c.bf16 %v338_v30, %v336_v29  ;;  %v307_v33 = vld [vmem:[%s266_s13] sm:$0xff]  ;;  %v306_v34 = vld [vmem:[%s257_s28] sm:$0xff] }
  0xae   : > { %742 = vmatprep.subr.bf16.mxu0 %v741_v5  ;;  %v514_v38 = vld [vmem:[%s1355_s4] sm:$0x3] }
  0xaf   : > { %v519_v41 = vrot.slane %v514_v38, %v518_v37  ;;  %v523_v44 = vrot.slane %v514_v38, %v522_v39 }
  0xb0   : > { %712 = vmatpush1.bf16.msra.mxu1 %v711_v11 }
  0xb1   : > { %744 = vmatpush1.bf16.msra.mxu0 %v743_v12  ;;  %714 = vmatprep.subr.bf16.mxu1 %v713_v13 }
  0xb2   : > { %746 = vmatprep.subr.bf16.mxu0 %v745_v17 }
  0xb4   : > { %716 = vmatpush1.bf16.msra.mxu1 %v715_v23 }
  0xb5   : > { %748 = vmatpush1.bf16.msra.mxu0 %v747_v24  ;;  %718 = vmatprep.subr.bf16.mxu1 %v717_v25 }
  0xb6   : > { %750 = vmatprep.subr.bf16.mxu0 %v749_v28 }
  0xb8   : > { %720 = vmatpush1.bf16.msra.mxu1 %v719_v31 }
  0xb9   : > { %752 = vmatpush1.bf16.msra.mxu0 %v751_v32 }
  0xbb   : > { %437 = vmatmul.mubr.f32.vlgmr.msra.gmra.mrb[0].mxu1 %v307_v33 }
  0xbc   : > { %508 = vmatmul.mubr.f32.vlgmr.msra.gmra.mrb[0].mxu0 %v306_v34 }
 0x18e   : > { %v438_v40 = vpop.f32.mrb[0].mxu1 }
 0x18f   : > { %v509_v42 = vpop.f32.mrb[0].mxu0  ;;  %v440_v43 = vpop.f32.mrb[1].mxu1 }
 0x190   : > { %v510_v45 = vadd.f32 %v509_v42, %v438_v40  ;;  %v511_v46 = vpop.f32.mrb[1].mxu0 }
 0x191   : > { %v512_v47 = vadd.f32 %v511_v46, %v440_v43 }
 0x192   : > { %v526_v48 = vadd.f32 %v519_v41, %v510_v45 }
 0x193   : > { %v527_v49 = vadd.f32 %v523_v44, %v512_v47 }
 0x194   : > { %v529_v50 = vmul.f32 0.70710677, %v526_v48  ;;  %v528_v56 = vmul.f32 0.5, %v526_v48 }
 0x195   : > { %v684_v51 = vmul.f32 -1.442695, %v527_v49 }
 0x197   : > { %830 = vpow2.f32 %v684_v51 }
 0x198   : > { %832 = verf.f32 %v529_v50 }
 0x1a1   : > { %v831_v52 = vpop.eup %830 }
 0x1a2   : > { %v833_v53 = vpop.eup %832  ;;  %v536_v54 = vadd.f32 1.0, %v831_v52 }
 0x1a3   : > { %v531_v55 = vadd.f32 1.0, %v833_v53 }
 0x1a4   : > { %834 = vrcp.f32 %v536_v54 }
 0x1a5   : > { %v532_v57 = vmul.f32 %v531_v55, %v528_v56 }
 0x1a7   : > { %v539_v58 = vsub.f32 %v532_v57, %v306_v34 }
 0x1ae   : > { %v835_v59 = vpop.eup %834 }
 0x1af   : > { %v540_v60 = vmul.f32 %v835_v59, %v539_v58 }
 0x1b1   : > { %v541_v61 = vadd.f32 %v540_v60, %v306_v34 }
 0x1b3   : > { %542 = vst [vmem:[%s305_s30] sm:$0xff] %v541_v61 }
 0x1b4   : > { %965 = shalt.err (!%p962_p7)
}
 0x1b5   : > { %s966_s17 = scalar_lea.hbm %s1307_s6, 128  ;;  %s970_s26 = scalar_lea.hbm %s1356_s5, 256 }
 0x1b6   : > { %p967_p1 = scmp.ne.s32.totalorder %s1307_s6, %s966_s17  ;;  %p971_p0 = scmp.lt.u32.totalorder %s1307_s6, %s1356_s5 }
 0x1b7   : > { %p972_p9 = scmp.lt.u32.totalorder %s970_s26, %s966_s17  ;;  %p974_p2 = scmp.lt.u32.totalorder %s966_s17, %s1307_s6 }
 0x1b8   : > { %p968_p8 = pnand %p967_p1, %p1378_p13 }
 0x1b9   : > { %p973_p12 = por %p972_p9, %p971_p0 }
 0x1ba   : > { %p969_p11 = pneg %p968_p8 }
 0x1bb   : > { %p975_p6 = por %p974_p2, %p973_p12 }
 0x1bd   : > { %p976_p10 = pnand %p975_p6, %p969_p11 }
 0x1bf   : > { %979 = shalt.err (!%p976_p10)
}
 0x1c0   : > { %767 = dma.vmem_to_hbm [thread:$0]  (%p1378_p13), %s1309_s15, 128, %s1307_s6, %s544_s8  }
 0x1c1 PF: > { %s569_s24 = sand.u32 1, %s1018_s18   ;;  %p1379_p4 = scmp.ne.s32.totalorder %s1364_s25, 0 }
 0x1c2   : > { %p1380_p5 = scmp.ge.s32.totalorder %s1030_s21, 2  ;;  %s570_s16 = scalar_lea.sflag [#allocation4], %s569_s24 }
 0x1c4   : > { %p784_p3 = pnand %p1380_p5, %p1379_p4 }
 0x1c6   : > { %1013 = dma.done.wait (!%p784_p3), %s570_s16, 128  }
 0x1c7   : > { %1015 = vsyncadd (!%p784_p3), %s570_s16, 4294967168  ;;  %p22_p7 = scmp.ge.s32.totalorder %s1180_s14, 4   ;;  %s1381_s18 = smov %s1022_s19 }
 0x1c8   : > { %s1382_s19 = smov %s1026_s20  ;;  %s1383_s20 = smov %s1196_s27 }
 0x1c9   : > { %s1384_s21 = smov %s1180_s14  ;;  %24 = sbr.rel (!%p22_p7) target bundleno = 11 (0xb), region = 106 }
 0x1d0   :  { %575 = vsyncpa [#allocation3], 1 }
 0x1d1   :  { %577 = vsyncpa [#allocation3 + $0x1], 1 }
 0x1d2   :  { %578 = vsyncpa [#allocation6], 1 }
 0x1d3   :  { %580 = vsyncpa [#allocation6 + $0x1], 1 }
 0x1d4   :  { %581 = vsyncpa [#allocation9], 1 }
 0x1d5   :  { %582 = vsyncpa [#allocation4], 1 }
 0x1d6   :  { %584 = vsyncpa [#allocation4 + $0x1], 1 }

// kernel: tpu_custom_call.1
= control target key start
LH: loop header
LB: loop body
LE: loop exit
PB: predicated region body
PF: predicated region fallthrough
CT: control target
= control target key end

     0   :  { %s1351_s0 = inlined_call_operand.hbm [shape: f32[16,128], index: 0, kind: input, shape index: {}]   ;;  %s1352_s1 = inlined_call_operand.hbm [shape: f32[16,128], index: 1, kind: input, shape index: {}]   ;;  %s1353_s2 = inlined_call_operand.hbm [shape: f32[128,256], index: 2, kind: input, shape index: {}]   ;;  %s1354_s3 = inlined_call_operand.hbm [shape: f32[128,256], index: 3, kind: input, shape index: {}]   ;;  %s1355_s4 = inlined_call_operand.vmem [shape: f32[1,256], index: 4, kind: input, shape index: {}]   ;;  %s1356_s5 = inlined_call_operand.hbm [shape: f32[16,128], index: 5, kind: output, shape index: {}]  }
   0x1   :  { %1361 = sst [smem:[#allocation16_spill]] %s1353_s2 }
   0x2   :  { %1362 = sst [smem:[#allocation17_spill]] %s1354_s3 }
   0x3   :  { %10 = vsyncpa [#allocation3], 0 }
   0x4   :  { %12 = vsyncpa [#allocation3 + $0x1], 0 }
   0x5   :  { %13 = vsyncpa [#allocation6], 0 }
   0x6   :  { %15 = vsyncpa [#allocation6 + $0x1], 0 }
   0x7   :  { %16 = vsyncpa [#allocation9], 0 }
   0x8   :  { %17 = vsyncpa [#allocation4], 0 }
   0x9   :  { %19 = vsyncpa [#allocation4 + $0x1], 0  ;;  %s1070_s18 = smov 0   ;;  %s1072_s19 = smov 0  }
   0xa   :  { %s1074_s20 = smov 0   ;;  %s1076_s21 = smov 0  }
   0xb LB: > { %s1091_s22 = sadd.s32 4294967295, %s1030_s21   ;;  %s669_s23 = sadd.s32 4294967294, %s1030_s21   ;;  %s1030_s21 = sphi %s1076_s21, %s1384_s21   ;;  %s1026_s20 = sphi %s1074_s20, %s1383_s20   ;;  %s1022_s19 = sphi %s1072_s19, %s1382_s19   ;;  %s1018_s18 = sphi %s1070_s18, %s1381_s18  }
   0xc   : > { %p45_p0 = scmp.ne.s32.totalorder %s1022_s19, %s1018_s18  ;;  %p1357_p1 = scmp.eq.s32.totalorder %s1091_s22, 0 }
   0xd   : > { %p164_p3 = scmp.eq.s32.totalorder %s669_s23, 1  ;;  %p670_p5 = scmp.ge.s32.totalorder %s1030_s21, 1 }
   0xe   : > { %p1100_p4 = por %p1357_p1, %p45_p0  ;;  %p171_p7 = scmp.lt.s32.totalorder %s1030_s21, 3 }
   0xf   : > { %p1105_p6 = por %p164_p3, %p45_p0  ;;  %s1032_s27 = smov [#allocation7]  }
  0x10   : > { %s1363_s24 = scalar_select %p1100_p4, 1, 0 }
  0x11   : > { %s1364_s25 = scalar_select %p1105_p6, 1, 0 }
  0x12   : > { %p1110_p8 = pnand %p670_p5, %p171_p7  ;;  %s183_s28 = sshll.u32 %s1032_s27, 4  ;;  %s1114_s28 = int_to_ptr.vmem [resolvable:$true] %s183_s28 }
  0x13   : > { %s1033_s30 = smov [#allocation8]   ;;  %s1367_s2 = sld [smem:[#allocation16_spill]] }
  0x14   : > { %s1365_s26 = scalar_select %p1110_p8, 1, 0 }
  0x15   : > { %p769_p9 = pneg %p1110_p8  ;;  %s196_s6 = sshll.u32 %s1033_s30, 4  ;;  %s1125_s6 = int_to_ptr.vmem [resolvable:$true] %s196_s6 }
  0x17   : > { %p1121_p11 = pnand %p769_p9, %p1357_p1 }
  0x19   : > { %s836_s9 = scalar_lea.hbm %s1367_s2, 4096  ;;  %p838_p13 = pneg %p1121_p11 }
  0x1a   : > { %p837_p12 = scmp.ne.s32.totalorder %s1367_s2, %s836_s9  ;;  %p843_p5 = scmp.lt.u32.totalorder %s836_s9, %s1367_s2 }
  0x1c   : > { %p839_p0 = pnand %p838_p13, %p837_p12 }
  0x1e   : > { %p840_p3 = pneg %p839_p0 }
  0x20   : > { %p845_p7 = pnand %p843_p5, %p840_p3 }
  0x22   : > { %848 = shalt.err (!%p845_p7)
}
  0x23   : > { %s849_s14 = scalar_lea.vmem %s1114_s28, 4096  ;;  %p857_p2 = scmp.lt.s32.totalorder %s1114_s28, %s1114_s28 }
  0x24   : > { %p850_p9 = scmp.ne.s32.totalorder %s1114_s28, %s849_s14  ;;  %p858_p12 = scmp.lt.s32.totalorder %s849_s14, %s849_s14 }
  0x26   : > { %p852_p10 = pnand %p850_p9, %p838_p13  ;;  %p859_p0 = por %p858_p12, %p857_p2 }
  0x28   : > { %p853_p1 = pneg %p852_p10 }
  0x2a   : > { %p860_p6 = pnand %p859_p0, %p853_p1 }
  0x2c   : > { %863 = shalt.err (!%p860_p6)
}
  0x2d   : > { %s1034_s15 = smov 256   ;;  %s1035_s16 = smov 16  }
  0x2e   : > { %772 = dma.hbm_to_vmem [thread:$0]  (!%p1121_p11), %s1367_s2, 4096, %s1114_s28, [#allocation6], %s1034_s15, %s1034_s15, %s1035_s16  }
  0x2f   : > { %s1368_s3 = sld [smem:[#allocation17_spill]] }
  0x35   : > { %s864_s7 = scalar_lea.hbm %s1368_s3, 4096 }
  0x36   : > { %p865_p2 = scmp.ne.s32.totalorder %s1368_s3, %s864_s7  ;;  %p871_p10 = scmp.lt.u32.totalorder %s864_s7, %s1368_s3 }
  0x38   : > { %p867_p1 = pnand %p865_p2, %p838_p13 }
  0x3a   : > { %p868_p6 = pneg %p867_p1 }
  0x3c   : > { %p873_p3 = pnand %p871_p10, %p868_p6 }
  0x3e   : > { %876 = shalt.err (!%p873_p3)
}
  0x3f   : > { %s877_s28 = scalar_lea.vmem %s1125_s6, 4096  ;;  %p885_p12 = scmp.lt.s32.totalorder %s1125_s6, %s1125_s6 }
  0x40   : > { %p878_p5 = scmp.ne.s32.totalorder %s1125_s6, %s877_s28  ;;  %p886_p0 = scmp.lt.s32.totalorder %s877_s28, %s877_s28 }
  0x42   : > { %p880_p7 = pnand %p878_p5, %p838_p13  ;;  %p887_p2 = por %p886_p0, %p885_p12 }
  0x44   : > { %p881_p9 = pneg %p880_p7 }
  0x46   : > { %p888_p1 = pnand %p887_p2, %p881_p9 }
  0x48   : > { %891 = shalt.err (!%p888_p1)
}
  0x49   : > { %775 = dma.hbm_to_vmem [thread:$0]  (!%p1121_p11), %s1368_s3, 4096, %s1125_s6, [#allocation9], %s1034_s15, %s1034_s15, %s1035_s16  }
  0x4a   : > { %s1180_s14 = sadd.s32 1, %s1030_s21   ;;  %s32_s29 = sadd.s32 1, %s1026_s20 }
  0x4b   : > { %s29_s17 = ssub.s32 %s1030_s21, %s1180_s14  ;;  %p39_p13 = scmp.ne.s32.totalorder %s1026_s20, %s1022_s19 }
  0x4c   : > { %p30_p6 = scmp.eq.s32.totalorder %s29_s17, 0  ;;  %p40_p10 = scmp.eq.s32.totalorder %s1030_s21, 0 }
  0x4d   : > { %p1369_p3 = scmp.eq.s32.totalorder %s1091_s22, 1  ;;  %p789_p7 = scmp.lt.s32.totalorder %s1030_s21, 2 }
  0x4e   : > { %s1196_s27 = scalar_select %p30_p6, %s1026_s20, %s32_s29  }
  0x4f   : > { %p1190_p5 = por %p1369_p3, %p39_p13  ;;  %p41_p9 = por %p40_p10, %p39_p13 }
  0x50   : > { %s213_s30 = sand.u32 1, %s1026_s20   ;;  %s675_s15 = sshll.u32 %s1030_s21, 7 }
  0x51   : > { %s1370_s23 = scalar_select %p1190_p5, 1, 0 }
  0x52   : > { %s1199_s6 = sshll.u32 %s213_s30, 3  ;;  %s1205_s8 = scalar_lea.hbm %s1351_s0, %s675_s15 }
  0x53   : > { %s217_s9 = scalar_lea.vmem [#allocation2], %s1199_s6  ;;  %p1210_p11 = pnand %p789_p7, %p41_p9 }
  0x54   : > { %s224_s10 = sshll.u32 %s217_s9, 4  ;;  %s1217_s13 = scalar_lea.hbm %s1352_s1, %s675_s15  ;;  %s1208_s10 = int_to_ptr.vmem [resolvable:$true] %s224_s10 }
  0x55   : > { %s231_s29 = sand.u32 1, %s1030_s21   ;;  %s214_s17 = scalar_lea.sflag [#allocation3], %s213_s30 }
  0x56   : > { %s892_s16 = scalar_lea.hbm %s1205_s8, 128  ;;  %p894_p0 = pneg %p1210_p11 }
  0x57   : > { %p893_p12 = scmp.ne.s32.totalorder %s1205_s8, %s892_s16  ;;  %s897_s2 = scalar_lea.hbm %s1351_s0, 256 }
  0x58   : > { %p898_p13 = scmp.lt.u32.totalorder %s1205_s8, %s1351_s0  ;;  %p899_p6 = scmp.lt.u32.totalorder %s897_s2, %s892_s16 }
  0x59   : > { %p895_p2 = pnand %p894_p0, %p893_p12  ;;  %p901_p3 = scmp.lt.u32.totalorder %s892_s16, %s1205_s8 }
  0x5a   : > { %p900_p10 = por %p899_p6, %p898_p13 }
  0x5b   : > { %p896_p1 = pneg %p895_p2 }
  0x5c   : > { %p902_p7 = por %p901_p3, %p900_p10 }
  0x5e   : > { %p903_p9 = pnand %p902_p7, %p896_p1 }
  0x60   : > { %906 = shalt.err (!%p903_p9)
}
  0x61   : > { %s907_s30 = scalar_lea.vmem %s1208_s10, 128  ;;  %s1036_s15 = smov [#allocation2]  }
  0x62   : > { %p908_p12 = scmp.ne.s32.totalorder %s1208_s10, %s907_s30  ;;  %s912_s12 = sshll.u32 %s1036_s15, 4  ;;  %s913_s12 = int_to_ptr.vmem [resolvable:$false] %s912_s12 }
  0x63   : > { %s914_s3 = scalar_lea.vmem %s913_s12, 256  ;;  %p915_p4 = scmp.lt.s32.totalorder %s1208_s10, %s913_s12 }
  0x64   : > { %p910_p2 = pnand %p908_p12, %p894_p0  ;;  %p916_p13 = scmp.lt.s32.totalorder %s914_s3, %s907_s30 }
  0x66   : > { %p911_p5 = pneg %p910_p2  ;;  %p917_p6 = por %p916_p13, %p915_p4 }
  0x68   : > { %p918_p10 = pnand %p917_p6, %p911_p5 }
  0x6a   : > { %921 = shalt.err (!%p918_p10)
}
  0x6b   : > { %779 = dma.hbm_to_vmem [thread:$0]  (!%p1210_p11), %s1205_s8, 128, %s1208_s10, %s214_s17  }
  0x6c   : > { %s235_s2 = scalar_lea.vmem [#allocation5], %s1199_s6  ;;  %s232_s7 = scalar_lea.sflag [#allocation6], %s231_s29 }
  0x6d   : > { %s242_s16 = sshll.u32 %s235_s2, 4  ;;  %s922_s9 = scalar_lea.hbm %s1217_s13, 128  ;;  %s243_s16 = int_to_ptr.vmem [resolvable:$true] %s242_s16 }
  0x6e   : > { %p923_p4 = scmp.ne.s32.totalorder %s1217_s13, %s922_s9  ;;  %s927_s15 = scalar_lea.hbm %s1352_s1, 256 }
  0x6f   : > { %p928_p3 = scmp.lt.u32.totalorder %s1217_s13, %s1352_s1  ;;  %p929_p7 = scmp.lt.u32.totalorder %s927_s15, %s922_s9 }
  0x70   : > { %p925_p5 = pnand %p923_p4, %p894_p0  ;;  %p931_p12 = scmp.lt.u32.totalorder %s922_s9, %s1217_s13 }
  0x71   : > { %p930_p9 = por %p929_p7, %p928_p3 }
  0x72   : > { %p926_p1 = pneg %p925_p5 }
  0x73   : > { %p932_p2 = por %p931_p12, %p930_p9 }
  0x75   : > { %p933_p13 = pnand %p932_p2, %p926_p1 }
  0x77   : > { %936 = shalt.err (!%p933_p13)
}
  0x78   : > { %s937_s6 = scalar_lea.vmem %s243_s16, 128  ;;  %s1037_s8 = smov [#allocation5]  }
  0x79   : > { %p938_p6 = scmp.ne.s32.totalorder %s243_s16, %s937_s6  ;;  %s942_s10 = sshll.u32 %s1037_s8, 4  ;;  %s943_s10 = int_to_ptr.vmem [resolvable:$false] %s942_s10 }
  0x7a   : > { %s944_s29 = scalar_lea.vmem %s943_s10, 256  ;;  %p945_p5 = scmp.lt.s32.totalorder %s243_s16, %s943_s10 }
  0x7b   : > { %p940_p10 = pnand %p938_p6, %p894_p0  ;;  %p946_p8 = scmp.lt.s32.totalorder %s944_s29, %s937_s6 }
  0x7d   : > { %p941_p4 = pneg %p940_p10  ;;  %p947_p3 = por %p946_p8, %p945_p5 }
  0x7f   : > { %p948_p7 = pnand %p947_p3, %p941_p4 }
  0x81   : > { %951 = shalt.err (!%p948_p7)
}
  0x82   : > { %782 = dma.hbm_to_vmem [thread:$0]  (!%p1210_p11), %s1217_s13, 128, %s243_s16, %s232_s7  }
  0x83   : > { %p1372_p1 = scmp.ne.s32.totalorder %s1365_s26, 0 }
  0x84   : > { %s1270_s17 = sand.u32 (!%p1372_p1), 1, %s1022_s19   ;;  %p1373_p8 = scmp.ne.s32.totalorder (!%p1372_p1), %s1363_s24, 0 }
  0x85   : > { %251 = sbr.rel (%p1372_p1) target bundleno = 449 (0x1c1), region = 40  ;;  %s1273_s2 = sshll.u32 (!%p1372_p1), %s1270_s17, 3 }
  0x86   : > { %s254_s9 = scalar_lea.sflag (!%p1372_p1), [#allocation3], %s1270_s17  ;;  %s257_s28 = scalar_lea.vmem (!%p1372_p1), [#allocation2], %s1273_s2 }
  0x8c   : > { %997 = dma.done.wait (%p1373_p8), %s254_s9, 128  }
  0x8d   : > { %999 = vsyncadd (%p1373_p8), %s254_s9, 4294967168  ;;  %s262_s26 = sand.u32 1, %s1091_s22   ;;  %s266_s13 = scalar_lea.vmem [#allocation5], %s1273_s2 }
  0x8e   : > { %s263_s11 = scalar_lea.sflag [#allocation6], %s262_s26 }
  0x8f   : > { %1001 = dma.done.wait (%p1373_p8), %s263_s11, 128  }
  0x90   : > { %1003 = vsyncadd (%p1373_p8), %s263_s11, 4294967168  ;;  %p1374_p11 = scmp.eq.s32.totalorder %s1091_s22, 0 }
  0x92   : > { %1005 = dma.done.wait (%p1374_p11), [#allocation6], 4096   ;;  %p1375_p0 = pmov %p1374_p11 }
  0x94   : > { %1007 = vsyncadd (%p1375_p0), [#allocation6], 4294963200  ;;  %p1376_p9 = pmov %p1375_p0 }
  0x95   : > { %p1377_p12 = pmov %p1375_p0 }
  0x96   : > { %1009 = dma.done.wait (%p1376_p9), [#allocation9], 4096  }
  0x97   : > { %1011 = vsyncadd (%p1377_p12), [#allocation9], 4294963200  ;;  %v1038_v0 = vmov 0.0   ;;  %v341_v1 = vld [vmem:[#allocation8 + $0x8] sm:$0xff]  ;;  %v343_v2 = vld [vmem:[#allocation8 + $0x18] sm:$0xff]  ;;  %s686_s7 = sshll.u32 %s1091_s22, 7 }
  0x98   : > { %436 = vmatprep.mubr.f32.mxu1 %v1038_v0  ;;  %507 = vmatprep.mubr.f32.mxu0 %v1038_v0  ;;  %v309_v3 = vld [vmem:[#allocation7 + $0x8] sm:$0xff]  ;;  %v689_v4 = vpack.c.bf16 %v343_v2, %v341_v1  ;;  %v311_v5 = vld [vmem:[#allocation7 + $0x18] sm:$0xff]  ;;  %v340_v6 = vld [vmem:[#allocation8] sm:$0xff]  ;;  %s305_s30 = scalar_lea.vmem [#allocation10], %s1273_s2  ;;  %s1307_s6 = scalar_lea.hbm %s1356_s5, %s686_s7 }
  0x99   : > { %v342_v7 = vld [vmem:[#allocation8 + $0x10] sm:$0xff]  ;;  %v721_v8 = vpack.c.bf16 %v311_v5, %v309_v3  ;;  %v308_v10 = vld [vmem:[#allocation7] sm:$0xff]  ;;  %v345_v12 = vld [vmem:[#allocation8 + $0x28] sm:$0xff]  ;;  %s557_s15 = sshll.u32 %s305_s30, 4  ;;  %s544_s8 = scalar_lea.sflag [#allocation4], %s1270_s17  ;;  %s1309_s15 = int_to_ptr.vmem [resolvable:$true] %s557_s15 }
  0x9a   : > { %v691_v9 = vpack.c.bf16 %v342_v7, %v340_v6  ;;  %v310_v11 = vld [vmem:[#allocation7 + $0x10] sm:$0xff]  ;;  %690 = vmatprep.subr.bf16.mxu1 %v689_v4  ;;  %v347_v14 = vld [vmem:[#allocation8 + $0x38] sm:$0xff]  ;;  %v313_v15 = vld [vmem:[#allocation7 + $0x28] sm:$0xff]  ;;  %s952_s10 = scalar_lea.vmem %s1309_s15, 128  ;;  %p1378_p13 = scmp.ne.s32.totalorder %s1370_s23, 0 }
  0x9b   : > { %v723_v13 = vpack.c.bf16 %v310_v11, %v308_v10  ;;  %v315_v16 = vld [vmem:[#allocation7 + $0x38] sm:$0xff]  ;;  %722 = vmatprep.subr.bf16.mxu0 %v721_v8  ;;  %v693_v17 = vpack.c.bf16 %v347_v14, %v345_v12  ;;  %v344_v19 = vld [vmem:[#allocation8 + $0x20] sm:$0xff]  ;;  %v346_v20 = vld [vmem:[#allocation8 + $0x30] sm:$0xff]  ;;  %p953_p2 = scmp.ne.s32.totalorder %s1309_s15, %s952_s10  ;;  %s1039_s22 = smov [#allocation10]  }
  0x9c   : > { %692 = vmatpush1.bf16.msra.mxu1 %v691_v9  ;;  %v725_v18 = vpack.c.bf16 %v315_v16, %v313_v15  ;;  %v312_v21 = vld [vmem:[#allocation7 + $0x20] sm:$0xff]  ;;  %v695_v22 = vpack.c.bf16 %v346_v20, %v344_v19  ;;  %v314_v23 = vld [vmem:[#allocation7 + $0x30] sm:$0xff]  ;;  %v349_v24 = vld [vmem:[#allocation8 + $0x48] sm:$0xff]  ;;  %s956_s29 = sshll.u32 %s1039_s22, 4  ;;  %s957_s29 = int_to_ptr.vmem [resolvable:$false] %s956_s29 }
  0x9d   : > { %724 = vmatpush1.bf16.msra.mxu0 %v723_v13  ;;  %v351_v25 = vld [vmem:[#allocation8 + $0x58] sm:$0xff]  ;;  %694 = vmatprep.subr.bf16.mxu1 %v693_v17  ;;  %v727_v26 = vpack.c.bf16 %v314_v23, %v312_v21  ;;  %v317_v28 = vld [vmem:[#allocation7 + $0x48] sm:$0xff]  ;;  %v348_v30 = vld [vmem:[#allocation8 + $0x40] sm:$0xff]  ;;  %p954_p6 = pnand %p953_p2, %p1378_p13  ;;  %s958_s2 = scalar_lea.vmem %s957_s29, 256 }
  0x9e   : > { %726 = vmatprep.subr.bf16.mxu0 %v725_v18  ;;  %v697_v27 = vpack.c.bf16 %v351_v25, %v349_v24  ;;  %v319_v29 = vld [vmem:[#allocation7 + $0x58] sm:$0xff]  ;;  %v350_v32 = vld [vmem:[#allocation8 + $0x50] sm:$0xff]  ;;  %v316_v33 = vld [vmem:[#allocation7 + $0x40] sm:$0xff]  ;;  %p959_p4 = scmp.lt.s32.totalorder %s1309_s15, %s957_s29  ;;  %p960_p5 = scmp.lt.s32.totalorder %s958_s2, %s952_s10 }
  0x9f   : > { %v729_v31 = vpack.c.bf16 %v319_v29, %v317_v28  ;;  %v318_v34 = vld [vmem:[#allocation7 + $0x50] sm:$0xff]  ;;  %v699_v35 = vpack.c.bf16 %v350_v32, %v348_v30  ;;  %v353_v36 = vld [vmem:[#allocation8 + $0x68] sm:$0xff]  ;;  %v355_v37 = vld [vmem:[#allocation8 + $0x78] sm:$0xff]  ;;  %p955_p10 = pneg %p954_p6 }
  0xa0   : > { %696 = vmatpush1.bf16.msra.mxu1 %v695_v22  ;;  %v321_v38 = vld [vmem:[#allocation7 + $0x68] sm:$0xff]  ;;  %v731_v39 = vpack.c.bf16 %v318_v34, %v316_v33  ;;  %v701_v40 = vpack.c.bf16 %v355_v37, %v353_v36  ;;  %v323_v41 = vld [vmem:[#allocation7 + $0x78] sm:$0xff]  ;;  %v352_v42 = vld [vmem:[#allocation8 + $0x60] sm:$0xff]  ;;  %p961_p3 = por %p960_p5, %p959_p4 }
  0xa1   : > { %728 = vmatpush1.bf16.msra.mxu0 %v727_v26  ;;  %698 = vmatprep.subr.bf16.mxu1 %v697_v27  ;;  %v354_v43 = vld [vmem:[#allocation8 + $0x70] sm:$0xff]  ;;  %v733_v44 = vpack.c.bf16 %v323_v41, %v321_v38  ;;  %v320_v45 = vld [vmem:[#allocation7 + $0x60] sm:$0xff]  ;;  %v357_v47 = vld [vmem:[#allocation8 + $0x88] sm:$0xff] }
  0xa2   : > { %730 = vmatprep.subr.bf16.mxu0 %v729_v31  ;;  %v322_v46 = vld [vmem:[#allocation7 + $0x70] sm:$0xff]  ;;  %v359_v48 = vld [vmem:[#allocation8 + $0x98] sm:$0xff]  ;;  %v325_v49 = vld [vmem:[#allocation7 + $0x88] sm:$0xff]  ;;  %v703_v51 = vpack.c.bf16 %v354_v43, %v352_v42  ;;  %p962_p7 = pnand %p961_p3, %p955_p10 }
  0xa3   : > { %v327_v50 = vld [vmem:[#allocation7 + $0x98] sm:$0xff]  ;;  %v735_v52 = vpack.c.bf16 %v322_v46, %v320_v45  ;;  %v705_v53 = vpack.c.bf16 %v359_v48, %v357_v47  ;;  %v356_v54 = vld [vmem:[#allocation8 + $0x80] sm:$0xff]  ;;  %v358_v55 = vld [vmem:[#allocation8 + $0x90] sm:$0xff] }
  0xa4   : > { %700 = vmatpush1.bf16.msra.mxu1 %v699_v35  ;;  %v324_v56 = vld [vmem:[#allocation7 + $0x80] sm:$0xff]  ;;  %v737_v57 = vpack.c.bf16 %v327_v50, %v325_v49  ;;  %v326_v58 = vld [vmem:[#allocation7 + $0x90] sm:$0xff]  ;;  %v361_v59 = vld [vmem:[#allocation8 + $0xa8] sm:$0xff]  ;;  %v707_v63 = vpack.c.bf16 %v358_v55, %v356_v54  ;;  %v516_v35 = vlaneseq }
  0xa5   : > { %732 = vmatpush1.bf16.msra.mxu0 %v731_v39  ;;  %702 = vmatprep.subr.bf16.mxu1 %v701_v40  ;;  %v363_v60 = vld [vmem:[#allocation8 + $0xb8] sm:$0xff]  ;;  %v329_v61 = vld [vmem:[#allocation7 + $0xa8] sm:$0xff]  ;;  %v739_v0 = vpack.c.bf16 %v326_v58, %v324_v56  ;;  %v360_v2 = vld [vmem:[#allocation8 + $0xa0] sm:$0xff] }
  0xa6   : > { %734 = vmatprep.subr.bf16.mxu0 %v733_v44  ;;  %v331_v62 = vld [vmem:[#allocation7 + $0xb8] sm:$0xff]  ;;  %v709_v1 = vpack.c.bf16 %v363_v60, %v361_v59  ;;  %v362_v3 = vld [vmem:[#allocation8 + $0xb0] sm:$0xff]  ;;  %v328_v4 = vld [vmem:[#allocation7 + $0xa0] sm:$0xff]  ;;  %v517_v36 = vshrl.u32 %v516_v35, 7 }
  0xa7   : > { %v741_v5 = vpack.c.bf16 %v331_v62, %v329_v61  ;;  %v330_v6 = vld [vmem:[#allocation7 + $0xb0] sm:$0xff]  ;;  %v365_v7 = vld [vmem:[#allocation8 + $0xc8] sm:$0xff]  ;;  %v367_v8 = vld [vmem:[#allocation8 + $0xd8] sm:$0xff]  ;;  %v711_v11 = vpack.c.bf16 %v362_v3, %v360_v2 }
  0xa8   : > { %704 = vmatpush1.bf16.msra.mxu1 %v703_v51  ;;  %v333_v9 = vld [vmem:[#allocation7 + $0xc8] sm:$0xff]  ;;  %v335_v10 = vld [vmem:[#allocation7 + $0xd8] sm:$0xff]  ;;  %v743_v12 = vpack.c.bf16 %v330_v6, %v328_v4  ;;  %v713_v13 = vpack.c.bf16 %v367_v8, %v365_v7  ;;  %v364_v14 = vld [vmem:[#allocation8 + $0xc0] sm:$0xff]  ;;  %v518_v37 = vsub.s32 0, %v517_v36  ;;  %v522_v39 = vsub.s32 1, %v517_v36 }
  0xa9   : > { %736 = vmatpush1.bf16.msra.mxu0 %v735_v52  ;;  %706 = vmatprep.subr.bf16.mxu1 %v705_v53  ;;  %v366_v15 = vld [vmem:[#allocation8 + $0xd0] sm:$0xff]  ;;  %v332_v16 = vld [vmem:[#allocation7 + $0xc0] sm:$0xff]  ;;  %v745_v17 = vpack.c.bf16 %v335_v10, %v333_v9  ;;  %v369_v19 = vld [vmem:[#allocation8 + $0xe8] sm:$0xff] }
  0xaa   : > { %738 = vmatprep.subr.bf16.mxu0 %v737_v57  ;;  %v334_v18 = vld [vmem:[#allocation7 + $0xd0] sm:$0xff]  ;;  %v371_v20 = vld [vmem:[#allocation8 + $0xf8] sm:$0xff]  ;;  %v337_v21 = vld [vmem:[#allocation7 + $0xe8] sm:$0xff]  ;;  %v715_v23 = vpack.c.bf16 %v366_v15, %v364_v14 }
  0xab   : > { %v339_v22 = vld [vmem:[#allocation7 + $0xf8] sm:$0xff]  ;;  %v747_v24 = vpack.c.bf16 %v334_v18, %v332_v16  ;;  %v717_v25 = vpack.c.bf16 %v371_v20, %v369_v19  ;;  %v368_v26 = vld [vmem:[#allocation8 + $0xe0] sm:$0xff]  ;;  %v370_v27 = vld [vmem:[#allocation8 + $0xf0] sm:$0xff] }
  0xac   : > { %708 = vmatpush1.bf16.msra.mxu1 %v707_v63  ;;  %v749_v28 = vpack.c.bf16 %v339_v22, %v337_v21  ;;  %v336_v29 = vld [vmem:[#allocation7 + $0xe0] sm:$0xff]  ;;  %v338_v30 = vld [vmem:[#allocation7 + $0xf0] sm:$0xff]  ;;  %v719_v31 = vpack.c.bf16 %v370_v27, %v368_v26 }
  0xad   : > { %740 = vmatpush1.bf16.msra.mxu0 %v739_v0  ;;  %710 = vmatprep.subr.bf16.mxu1 %v709_v1  ;;  %v751_v32 = vpack.c.bf16 %v338_v30, %v336_v29  ;;  %v307_v33 = vld [vmem:[%s266_s13] sm:$0xff]  ;;  %v306_v34 = vld [vmem:[%s257_s28] sm:$0xff] }
  0xae   : > { %742 = vmatprep.subr.bf16.mxu0 %v741_v5  ;;  %v514_v38 = vld [vmem:[%s1355_s4] sm:$0x3] }
  0xaf   : > { %v519_v41 = vrot.slane %v514_v38, %v518_v37  ;;  %v523_v44 = vrot.slane %v514_v38, %v522_v39 }
  0xb0   : > { %712 = vmatpush1.bf16.msra.mxu1 %v711_v11 }
  0xb1   : > { %744 = vmatpush1.bf16.msra.mxu0 %v743_v12  ;;  %714 = vmatprep.subr.bf16.mxu1 %v713_v13 }
  0xb2   : > { %746 = vmatprep.subr.bf16.mxu0 %v745_v17 }
  0xb4   : > { %716 = vmatpush1.bf16.msra.mxu1 %v715_v23 }
  0xb5   : > { %748 = vmatpush1.bf16.msra.mxu0 %v747_v24  ;;  %718 = vmatprep.subr.bf16.mxu1 %v717_v25 }
  0xb6   : > { %750 = vmatprep.subr.bf16.mxu0 %v749_v28 }
  0xb8   : > { %720 = vmatpush1.bf16.msra.mxu1 %v719_v31 }
  0xb9   : > { %752 = vmatpush1.bf16.msra.mxu0 %v751_v32 }
  0xbb   : > { %437 = vmatmul.mubr.f32.vlgmr.msra.gmra.mrb[0].mxu1 %v307_v33 }
  0xbc   : > { %508 = vmatmul.mubr.f32.vlgmr.msra.gmra.mrb[0].mxu0 %v306_v34 }
 0x18e   : > { %v438_v40 = vpop.f32.mrb[0].mxu1 }
 0x18f   : > { %v509_v42 = vpop.f32.mrb[0].mxu0  ;;  %v440_v43 = vpop.f32.mrb[1].mxu1 }
 0x190   : > { %v510_v45 = vadd.f32 %v509_v42, %v438_v40  ;;  %v511_v46 = vpop.f32.mrb[1].mxu0 }
 0x191   : > { %v512_v47 = vadd.f32 %v511_v46, %v440_v43 }
 0x192   : > { %v526_v48 = vadd.f32 %v519_v41, %v510_v45 }
 0x193   : > { %v527_v49 = vadd.f32 %v523_v44, %v512_v47 }
 0x194   : > { %v529_v50 = vmul.f32 0.70710677, %v526_v48  ;;  %v528_v56 = vmul.f32 0.5, %v526_v48 }
 0x195   : > { %v684_v51 = vmul.f32 -1.442695, %v527_v49 }
 0x197   : > { %830 = vpow2.f32 %v684_v51 }
 0x198   : > { %832 = verf.f32 %v529_v50 }
 0x1a1   : > { %v831_v52 = vpop.eup %830 }
 0x1a2   : > { %v833_v53 = vpop.eup %832  ;;  %v536_v54 = vadd.f32 1.0, %v831_v52 }
 0x1a3   : > { %v531_v55 = vadd.f32 1.0, %v833_v53 }
 0x1a4   : > { %834 = vrcp.f32 %v536_v54 }
 0x1a5   : > { %v532_v57 = vmul.f32 %v531_v55, %v528_v56 }
 0x1a7   : > { %v539_v58 = vsub.f32 %v532_v57, %v306_v34 }
 0x1ae   : > { %v835_v59 = vpop.eup %834 }
 0x1af   : > { %v540_v60 = vmul.f32 %v835_v59, %v539_v58 }
 0x1b1   : > { %v541_v61 = vadd.f32 %v540_v60, %v306_v34 }
 0x1b3   : > { %542 = vst [vmem:[%s305_s30] sm:$0xff] %v541_v61 }
 0x1b4   : > { %965 = shalt.err (!%p962_p7)
}
 0x1b5   : > { %s966_s17 = scalar_lea.hbm %s1307_s6, 128  ;;  %s970_s26 = scalar_lea.hbm %s1356_s5, 256 }
 0x1b6   : > { %p967_p1 = scmp.ne.s32.totalorder %s1307_s6, %s966_s17  ;;  %p971_p0 = scmp.lt.u32.totalorder %s1307_s6, %s1356_s5 }
 0x1b7   : > { %p972_p9 = scmp.lt.u32.totalorder %s970_s26, %s966_s17  ;;  %p974_p2 = scmp.lt.u32.totalorder %s966_s17, %s1307_s6 }
 0x1b8   : > { %p968_p8 = pnand %p967_p1, %p1378_p13 }
 0x1b9   : > { %p973_p12 = por %p972_p9, %p971_p0 }
 0x1ba   : > { %p969_p11 = pneg %p968_p8 }
 0x1bb   : > { %p975_p6 = por %p974_p2, %p973_p12 }
 0x1bd   : > { %p976_p10 = pnand %p975_p6, %p969_p11 }
 0x1bf   : > { %979 = shalt.err (!%p976_p10)
}
 0x1c0   : > { %767 = dma.vmem_to_hbm [thread:$0]  (%p1378_p13), %s1309_s15, 128, %s1307_s6, %s544_s8  }
 0x1c1 PF: > { %s569_s24 = sand.u32 1, %s1018_s18   ;;  %p1379_p4 = scmp.ne.s32.totalorder %s1364_s25, 0 }
 0x1c2   : > { %p1380_p5 = scmp.ge.s32.totalorder %s1030_s21, 2  ;;  %s570_s16 = scalar_lea.sflag [#allocation4], %s569_s24 }
 0x1c4   : > { %p784_p3 = pnand %p1380_p5, %p1379_p4 }
 0x1c6   : > { %1013 = dma.done.wait (!%p784_p3), %s570_s16, 128  }
 0x1c7   : > { %1015 = vsyncadd (!%p784_p3), %s570_s16, 4294967168  ;;  %p22_p7 = scmp.ge.s32.totalorder %s1180_s14, 4   ;;  %s1381_s18 = smov %s1022_s19 }
 0x1c8   : > { %s1382_s19 = smov %s1026_s20  ;;  %s1383_s20 = smov %s1196_s27 }
 0x1c9   : > { %s1384_s21 = smov %s1180_s14  ;;  %24 = sbr.rel (!%p22_p7) target bundleno = 11 (0xb), region = 106 }
 0x1d0   :  { %575 = vsyncpa [#allocation3], 1 }
 0x1d1   :  { %577 = vsyncpa [#allocation3 + $0x1], 1 }
 0x1d2   :  { %578 = vsyncpa [#allocation6], 1 }
 0x1d3   :  { %580 = vsyncpa [#allocation6 + $0x1], 1 }
 0x1d4   :  { %581 = vsyncpa [#allocation9], 1 }
 0x1d5   :  { %582 = vsyncpa [#allocation4], 1 }
 0x1d6   :  { %584 = vsyncpa [#allocation4 + $0x1], 1 }

</bundles_post_ra>
